<compile_context>
chip_gen: v7x
topology: tpu7x:2x2x1
jax: 0.10.0
libtpu: 0.0.40
codegen_flags: <defaults>
</compile_context>

<pallas_src>
import jax
import jax.numpy as jnp
from jax.experimental import pallas as pl
from jax.experimental.pallas import tpu as pltpu

LANE = 128


# ----------------------------- Pallas kernel ------------------------------- #

def _wn_causal_conv(h, v_taps, g, b, dilation, seg):
    """Weight-normed dilated causal conv on batch-folded activations.

    h:      (Ci, W) activations, W = B * seg (seg = per-batch length, padded).
    v_taps: (K, Co, Ci) weight_v, tap-major.
    g, b:   (Co, 1) weight_g / bias.
    Returns (Co, W) float32.
    """
    K, Co, Ci = v_taps.shape
    width = h.shape[-1]

    # weight-norm scale g / ||v|| per output channel (norm over Ci and K taps).
    ssq = jnp.sum(jnp.sum(v_taps * v_taps, axis=2, keepdims=True), axis=0)   # (Co, 1)
    scale = g * jax.lax.rsqrt(ssq)

    t = jax.lax.broadcasted_iota(jnp.int32, (Ci, width), dimension=1)
    local_t = t % seg                      # position within each batch segment

    acc = jnp.zeros((Co, width), jnp.float32)
    for j in range(K):
        shift = (K - 1 - j) * dilation
        if shift == 0:
            xs = h
        else:
            rolled = pltpu.roll(h, shift=shift, axis=1)
            # zero the causal pad AND anything rolled across a batch seam
            xs = jnp.where(local_t >= shift, rolled, 0.0)
        acc = acc + jnp.dot(v_taps[j], xs, preferred_element_type=jnp.float32)
    return scale * acc + b


def _make_tcn_kernel(blocks, seg):
    """blocks: tuple of static per-level configs {dilation, downsample}."""

    def kernel(*refs):
        x_ref = refs[0]
        o_ref = refs[-1]
        h = x_ref[...].astype(jnp.float32)          # (C_in, B*seg)
        idx = 1
        for blk in blocks:
            v1 = refs[idx][...]; g1 = refs[idx + 1][...]; b1 = refs[idx + 2][...]
            v2 = refs[idx + 3][...]; g2 = refs[idx + 4][...]; b2 = refs[idx + 5][...]
            idx += 6
            if blk["downsample"]:
                wd = refs[idx][...]; bd = refs[idx + 1][...]
                idx += 2

            d = blk["dilation"]
            out = _wn_causal_conv(h, v1, g1, b1, d, seg)
            out = jnp.maximum(out, 0.0)
            # TODO(synk): nn.Dropout(p=0.2) treated as identity (eval-mode forward).
            out = _wn_causal_conv(out, v2, g2, b2, d, seg)
            out = jnp.maximum(out, 0.0)

            if blk["downsample"]:
                res = jnp.dot(wd, h, preferred_element_type=jnp.float32) + bd
            else:
                res = h
            h = jnp.maximum(out + res, 0.0)
        o_ref[...] = h.astype(o_ref.dtype)

    return kernel


# ------------------------------- Wrapper ----------------------------------- #

def temporal_conv_net(x, params, kernel_size=2):
    """x: (B, C_in, L) float32. params: list of per-level dicts (see init_params)."""
    B, C_in, L = x.shape
    seg = ((L + LANE - 1) // LANE) * LANE          # per-batch length, lane aligned
    wcols = B * seg

    # Fold to a lane-dense 2-D slab (C, B*seg), time last. Pure layout plumbing.
    xp = jnp.pad(x, ((0, 0), (0, 0), (0, seg - L)))
    x2d = jnp.transpose(xp, (1, 0, 2)).reshape(C_in, wcols)

    flat_inputs = [x2d]
    blocks = []
    c_prev = C_in
    for i, p in enumerate(params):
        v1, v2 = p["v1"], p["v2"]
        c_out = v1.shape[0]
        assert v1.shape == (c_out, c_prev, kernel_size)
        assert v2.shape == (c_out, c_out, kernel_size)
        dilation = 2 ** i
        assert (kernel_size - 1) * dilation < seg
        downsample = c_prev != c_out

        flat_inputs += [
            jnp.transpose(v1, (2, 0, 1)),           # (K, Co, Ci), tap-major
            p["g1"].reshape(c_out, 1),
            p["b1"].reshape(c_out, 1),
            jnp.transpose(v2, (2, 0, 1)),
            p["g2"].reshape(c_out, 1),
            p["b2"].reshape(c_out, 1),
        ]
        if downsample:
            flat_inputs += [p["wd"].reshape(c_out, c_prev),
                            p["bd"].reshape(c_out, 1)]
        blocks.append({"dilation": dilation, "downsample": downsample})
        c_prev = c_out

    kernel = _make_tcn_kernel(tuple(blocks), seg)
    n_in = len(flat_inputs)
    y2d = pl.pallas_call(
        kernel,
        out_shape=jax.ShapeDtypeStruct((c_prev, wcols), x.dtype),
        in_specs=[pl.BlockSpec(memory_space=pltpu.MemorySpace.VMEM)] * n_in,
        out_specs=pl.BlockSpec(memory_space=pltpu.MemorySpace.VMEM),
    )(*flat_inputs)

    # Unfold (C_out, B*seg) -> (B, C_out, L)
    return jnp.transpose(y2d.reshape(c_prev, B, seg), (1, 0, 2))[:, :, :L]


# -------------------------- Pure-JAX reference ----------------------------- #

def _weight_norm(v, g):
    # v: (Co, Ci, K), g: (Co,). weight_norm(dim=0): norm over (Ci, K).
    nrm = jnp.sqrt(jnp.sum(v * v, axis=(1, 2), keepdims=True))
    return (g[:, None, None] / nrm) * v


def _ref_causal_conv(x, w, b, dilation):
    B, Ci, L = x.shape
    Co, _, K = w.shape
    pad = (K - 1) * dilation
    xp = jnp.pad(x, ((0, 0), (0, 0), (pad, 0)))
    out = jnp.broadcast_to(b[None, :, None], (B, Co, L)).astype(jnp.float32)
    for j in range(K):
        out = out + jnp.einsum("oc,bcl->bol", w[:, :, j],
                               xp[:, :, j * dilation: j * dilation + L],
                               precision=jax.lax.Precision.HIGHEST)
    return out


def tcn_reference(x, params, kernel_size=2):
    h = x
    for i, p in enumerate(params):
        d = 2 ** i
        out = jnp.maximum(
            _ref_causal_conv(h, _weight_norm(p["v1"], p["g1"]), p["b1"], d), 0.0)
        out = jnp.maximum(
            _ref_causal_conv(out, _weight_norm(p["v2"], p["g2"]), p["b2"], d), 0.0)
        if "wd" in p:
            res = jnp.einsum("oc,bcl->bol", p["wd"][:, :, 0], h,
                             precision=jax.lax.Precision.HIGHEST) + p["bd"][None, :, None]
        else:
            res = h
        h = jnp.maximum(out + res, 0.0)
    return h


# ---------------------------- Param construction --------------------------- #

def init_params(key, num_inputs, num_channels, kernel_size=2):
    params = []
    c_prev = num_inputs
    for c_out in num_channels:
        keys = jax.random.split(key, 8)
        key = keys[0]
        p = {
            "v1": 0.1 * jax.random.normal(keys[1], (c_out, c_prev, kernel_size), jnp.float32),
            "g1": 1.0 + 0.1 * jax.random.normal(keys[2], (c_out,), jnp.float32),
            "b1": 0.1 * jax.random.normal(keys[3], (c_out,), jnp.float32),
            "v2": 0.1 * jax.random.normal(keys[4], (c_out, c_out, kernel_size), jnp.float32),
            "g2": 1.0 + 0.1 * jax.random.normal(keys[5], (c_out,), jnp.float32),
            "b2": 0.1 * jax.random.normal(keys[6], (c_out,), jnp.float32),
        }
        if c_prev != c_out:
            k7, k8 = jax.random.split(keys[7])
            p["wd"] = 0.1 * jax.random.normal(k7, (c_out, c_prev, 1), jnp.float32)
            p["bd"] = 0.1 * jax.random.normal(k8, (c_out,), jnp.float32)
        params.append(p)
        c_prev = c_out
    return params


if __name__ == "__main__":
    B, num_inputs, L = 2, 4, 16
    num_channels = (8, 16, 16)      # dilations 1, 2, 4; both residual paths used
    kernel_size = 2

    key = jax.random.PRNGKey(0)
    kx, kp = jax.random.split(key)
    x = jax.random.normal(kx, (B, num_inputs, L), dtype=jnp.float32)
    params = init_params(kp, num_inputs, num_channels, kernel_size)

    out = temporal_conv_net(x, params, kernel_size=kernel_size)
    out = jax.block_until_ready(out)

    ref = tcn_reference(x, params, kernel_size=kernel_size)
    assert out.shape == (B, num_channels[-1], L), out.shape
    assert jnp.allclose(out, ref, atol=1e-3, rtol=1e-3), \
        float(jnp.max(jnp.abs(out - ref)))

    print("KERNEL_OK")
</pallas_src>

<mosaic_0001>
module attributes {stable_mosaic.version = 11 : i64} {
  func.func @kernel(%arg0: memref<4x256xf32, #tpu.memory_space<vmem>>, %arg1: memref<2x8x4xf32, #tpu.memory_space<vmem>>, %arg2: memref<8x1xf32, #tpu.memory_space<vmem>>, %arg3: memref<8x1xf32, #tpu.memory_space<vmem>>, %arg4: memref<2x8x8xf32, #tpu.memory_space<vmem>>, %arg5: memref<8x1xf32, #tpu.memory_space<vmem>>, %arg6: memref<8x1xf32, #tpu.memory_space<vmem>>, %arg7: memref<8x4xf32, #tpu.memory_space<vmem>>, %arg8: memref<8x1xf32, #tpu.memory_space<vmem>>, %arg9: memref<2x16x8xf32, #tpu.memory_space<vmem>>, %arg10: memref<16x1xf32, #tpu.memory_space<vmem>>, %arg11: memref<16x1xf32, #tpu.memory_space<vmem>>, %arg12: memref<2x16x16xf32, #tpu.memory_space<vmem>>, %arg13: memref<16x1xf32, #tpu.memory_space<vmem>>, %arg14: memref<16x1xf32, #tpu.memory_space<vmem>>, %arg15: memref<16x8xf32, #tpu.memory_space<vmem>>, %arg16: memref<16x1xf32, #tpu.memory_space<vmem>>, %arg17: memref<2x16x16xf32, #tpu.memory_space<vmem>>, %arg18: memref<16x1xf32, #tpu.memory_space<vmem>>, %arg19: memref<16x1xf32, #tpu.memory_space<vmem>>, %arg20: memref<2x16x16xf32, #tpu.memory_space<vmem>>, %arg21: memref<16x1xf32, #tpu.memory_space<vmem>>, %arg22: memref<16x1xf32, #tpu.memory_space<vmem>>, %arg23: memref<16x256xf32, #tpu.memory_space<vmem>>) attributes {dimension_semantics = [], scalar_prefetch = 0 : i64, scratch_operands = 0 : i64, tpu.core_type = #tpu.core_type<tc>} {
    %c0 = arith.constant 0 : index
    %c0_0 = arith.constant 0 : index
    %0 = vector.load %arg0[%c0, %c0_0] : memref<4x256xf32, #tpu.memory_space<vmem>>, vector<4x256xf32>
    %c0_1 = arith.constant 0 : index
    %c0_2 = arith.constant 0 : index
    %c0_3 = arith.constant 0 : index
    %1 = vector.load %arg1[%c0_1, %c0_2, %c0_3] : memref<2x8x4xf32, #tpu.memory_space<vmem>>, vector<2x8x4xf32>
    %c0_4 = arith.constant 0 : index
    %c0_5 = arith.constant 0 : index
    %2 = vector.load %arg2[%c0_4, %c0_5] : memref<8x1xf32, #tpu.memory_space<vmem>>, vector<8x1xf32>
    %c0_6 = arith.constant 0 : index
    %c0_7 = arith.constant 0 : index
    %3 = vector.load %arg3[%c0_6, %c0_7] : memref<8x1xf32, #tpu.memory_space<vmem>>, vector<8x1xf32>
    %c0_8 = arith.constant 0 : index
    %c0_9 = arith.constant 0 : index
    %c0_10 = arith.constant 0 : index
    %4 = vector.load %arg4[%c0_8, %c0_9, %c0_10] : memref<2x8x8xf32, #tpu.memory_space<vmem>>, vector<2x8x8xf32>
    %c0_11 = arith.constant 0 : index
    %c0_12 = arith.constant 0 : index
    %5 = vector.load %arg5[%c0_11, %c0_12] : memref<8x1xf32, #tpu.memory_space<vmem>>, vector<8x1xf32>
    %c0_13 = arith.constant 0 : index
    %c0_14 = arith.constant 0 : index
    %6 = vector.load %arg6[%c0_13, %c0_14] : memref<8x1xf32, #tpu.memory_space<vmem>>, vector<8x1xf32>
    %c0_15 = arith.constant 0 : index
    %c0_16 = arith.constant 0 : index
    %7 = vector.load %arg7[%c0_15, %c0_16] : memref<8x4xf32, #tpu.memory_space<vmem>>, vector<8x4xf32>
    %c0_17 = arith.constant 0 : index
    %c0_18 = arith.constant 0 : index
    %8 = vector.load %arg8[%c0_17, %c0_18] : memref<8x1xf32, #tpu.memory_space<vmem>>, vector<8x1xf32>
    %9 = arith.mulf %1, %1 : vector<2x8x4xf32>
    %cst = arith.constant dense<0.000000e+00> : vector<2x8xf32>
    %10 = vector.multi_reduction <add>, %9, %cst [2] : vector<2x8x4xf32> to vector<2x8xf32>
    %11 = vector.shape_cast %10 : vector<2x8xf32> to vector<2x8x1xf32>
    %cst_19 = arith.constant dense<0.000000e+00> : vector<8x1xf32>
    %12 = vector.multi_reduction <add>, %11, %cst_19 [0] : vector<2x8x1xf32> to vector<8x1xf32>
    %13 = math.rsqrt %12 : vector<8x1xf32>
    %14 = arith.mulf %2, %13 : vector<8x1xf32>
    %15 = tpu.iota {dimensions = array<i32: 1>} : vector<4x256xi32>
    %c128_i32 = arith.constant 128 : i32
    %c0_i32 = arith.constant 0 : i32
    %16 = arith.cmpi eq, %c128_i32, %c0_i32 : i32
    %c1_i32 = arith.constant 1 : i32
    %17 = arith.select %16, %c1_i32, %c128_i32 : i32
    %18 = vector.broadcast %17 : i32 to vector<4x256xi32>
    %19 = arith.remsi %15, %18 : vector<4x256xi32>
    %c0_i32_20 = arith.constant 0 : i32
    %20 = vector.broadcast %c0_i32_20 : i32 to vector<4x256xi32>
    %21 = arith.cmpi ne, %19, %20 : vector<4x256xi32>
    %c0_i32_21 = arith.constant 0 : i32
    %22 = vector.broadcast %c0_i32_21 : i32 to vector<4x256xi32>
    %23 = arith.cmpi slt, %19, %22 : vector<4x256xi32>
    %c0_i32_22 = arith.constant 0 : i32
    %24 = arith.cmpi slt, %17, %c0_i32_22 : i32
    %25 = vector.broadcast %24 : i1 to vector<4x256xi1>
    %26 = vector.broadcast %25 : vector<4x256xi1> to vector<4x256xi1>
    %27 = arith.xori %23, %26 : vector<4x256xi1>
    %28 = arith.andi %27, %21 : vector<4x256xi1>
    %29 = vector.broadcast %17 : i32 to vector<4x256xi32>
    %30 = arith.addi %19, %29 : vector<4x256xi32>
    %31 = arith.select %28, %30, %19 : vector<4x256xi1>, vector<4x256xi32>
    %cst_23 = arith.constant 0.000000e+00 : f32
    %32 = vector.broadcast %cst_23 : f32 to vector<8x256xf32>
    %c1_i32_24 = arith.constant 1 : i32
    %33 = tpu.dynamic_rotate %0 by %c1_i32_24 dim 1 : vector<4x256xf32>, i32 -> vector<4x256xf32>
    %c1_i32_25 = arith.constant 1 : i32
    %34 = vector.broadcast %c1_i32_25 : i32 to vector<4x256xi32>
    %35 = arith.cmpi sge, %31, %34 : vector<4x256xi32>
    %cst_26 = arith.constant 0.000000e+00 : f32
    %36 = vector.broadcast %cst_26 : f32 to vector<4x256xf32>
    %37 = arith.select %35, %33, %36 : vector<4x256xi1>, vector<4x256xf32>
    %38 = vector.extract_strided_slice %1 {offsets = [0, 0, 0], sizes = [1, 8, 4], strides = [1, 1, 1]} : vector<2x8x4xf32> to vector<1x8x4xf32>
    %39 = vector.shape_cast %38 : vector<1x8x4xf32> to vector<8x4xf32>
    %cst_27 = arith.constant dense<0.000000e+00> : vector<8x256xf32>
    %40 = tpu.matmul %39, %37, %cst_27 {dimension_numbers = #tpu.dot_dimension_numbers<[1], [0], [0], [1], [0, 0, 1, 1], [], []>} : vector<8x4xf32>, vector<4x256xf32>, vector<8x256xf32> -> vector<8x256xf32>
    %41 = arith.addf %32, %40 : vector<8x256xf32>
    %42 = vector.extract_strided_slice %1 {offsets = [1, 0, 0], sizes = [1, 8, 4], strides = [1, 1, 1]} : vector<2x8x4xf32> to vector<1x8x4xf32>
    %43 = vector.shape_cast %42 : vector<1x8x4xf32> to vector<8x4xf32>
    %cst_28 = arith.constant dense<0.000000e+00> : vector<8x256xf32>
    %44 = tpu.matmul %43, %0, %cst_28 {dimension_numbers = #tpu.dot_dimension_numbers<[1], [0], [0], [1], [0, 0, 1, 1], [], []>} : vector<8x4xf32>, vector<4x256xf32>, vector<8x256xf32> -> vector<8x256xf32>
    %45 = arith.addf %41, %44 : vector<8x256xf32>
    %46 = vector.broadcast %14 : vector<8x1xf32> to vector<8x256xf32>
    %47 = arith.mulf %46, %45 : vector<8x256xf32>
    %48 = vector.broadcast %3 : vector<8x1xf32> to vector<8x256xf32>
    %49 = arith.addf %47, %48 : vector<8x256xf32>
    %cst_29 = arith.constant 0.000000e+00 : f32
    %50 = vector.broadcast %cst_29 : f32 to vector<8x256xf32>
    %51 = arith.maximumf %49, %50 : vector<8x256xf32>
    %52 = arith.mulf %4, %4 : vector<2x8x8xf32>
    %cst_30 = arith.constant dense<0.000000e+00> : vector<2x8xf32>
    %53 = vector.multi_reduction <add>, %52, %cst_30 [2] : vector<2x8x8xf32> to vector<2x8xf32>
    %54 = vector.shape_cast %53 : vector<2x8xf32> to vector<2x8x1xf32>
    %cst_31 = arith.constant dense<0.000000e+00> : vector<8x1xf32>
    %55 = vector.multi_reduction <add>, %54, %cst_31 [0] : vector<2x8x1xf32> to vector<8x1xf32>
    %56 = math.rsqrt %55 : vector<8x1xf32>
    %57 = arith.mulf %5, %56 : vector<8x1xf32>
    %58 = tpu.iota {dimensions = array<i32: 1>} : vector<8x256xi32>
    %c128_i32_32 = arith.constant 128 : i32
    %c0_i32_33 = arith.constant 0 : i32
    %59 = arith.cmpi eq, %c128_i32_32, %c0_i32_33 : i32
    %c1_i32_34 = arith.constant 1 : i32
    %60 = arith.select %59, %c1_i32_34, %c128_i32_32 : i32
    %61 = vector.broadcast %60 : i32 to vector<8x256xi32>
    %62 = arith.remsi %58, %61 : vector<8x256xi32>
    %c0_i32_35 = arith.constant 0 : i32
    %63 = vector.broadcast %c0_i32_35 : i32 to vector<8x256xi32>
    %64 = arith.cmpi ne, %62, %63 : vector<8x256xi32>
    %c0_i32_36 = arith.constant 0 : i32
    %65 = vector.broadcast %c0_i32_36 : i32 to vector<8x256xi32>
    %66 = arith.cmpi slt, %62, %65 : vector<8x256xi32>
    %c0_i32_37 = arith.constant 0 : i32
    %67 = arith.cmpi slt, %60, %c0_i32_37 : i32
    %68 = vector.broadcast %67 : i1 to vector<8x256xi1>
    %69 = vector.broadcast %68 : vector<8x256xi1> to vector<8x256xi1>
    %70 = arith.xori %66, %69 : vector<8x256xi1>
    %71 = arith.andi %70, %64 : vector<8x256xi1>
    %72 = vector.broadcast %60 : i32 to vector<8x256xi32>
    %73 = arith.addi %62, %72 : vector<8x256xi32>
    %74 = arith.select %71, %73, %62 : vector<8x256xi1>, vector<8x256xi32>
    %cst_38 = arith.constant 0.000000e+00 : f32
    %75 = vector.broadcast %cst_38 : f32 to vector<8x256xf32>
    %c1_i32_39 = arith.constant 1 : i32
    %76 = tpu.dynamic_rotate %51 by %c1_i32_39 dim 1 : vector<8x256xf32>, i32 -> vector<8x256xf32>
    %c1_i32_40 = arith.constant 1 : i32
    %77 = vector.broadcast %c1_i32_40 : i32 to vector<8x256xi32>
    %78 = arith.cmpi sge, %74, %77 : vector<8x256xi32>
    %cst_41 = arith.constant 0.000000e+00 : f32
    %79 = vector.broadcast %cst_41 : f32 to vector<8x256xf32>
    %80 = arith.select %78, %76, %79 : vector<8x256xi1>, vector<8x256xf32>
    %81 = vector.extract_strided_slice %4 {offsets = [0, 0, 0], sizes = [1, 8, 8], strides = [1, 1, 1]} : vector<2x8x8xf32> to vector<1x8x8xf32>
    %82 = vector.shape_cast %81 : vector<1x8x8xf32> to vector<8x8xf32>
    %cst_42 = arith.constant dense<0.000000e+00> : vector<8x256xf32>
    %83 = tpu.matmul %82, %80, %cst_42 {dimension_numbers = #tpu.dot_dimension_numbers<[1], [0], [0], [1], [0, 0, 1, 1], [], []>} : vector<8x8xf32>, vector<8x256xf32>, vector<8x256xf32> -> vector<8x256xf32>
    %84 = arith.addf %75, %83 : vector<8x256xf32>
    %85 = vector.extract_strided_slice %4 {offsets = [1, 0, 0], sizes = [1, 8, 8], strides = [1, 1, 1]} : vector<2x8x8xf32> to vector<1x8x8xf32>
    %86 = vector.shape_cast %85 : vector<1x8x8xf32> to vector<8x8xf32>
    %cst_43 = arith.constant dense<0.000000e+00> : vector<8x256xf32>
    %87 = tpu.matmul %86, %51, %cst_43 {dimension_numbers = #tpu.dot_dimension_numbers<[1], [0], [0], [1], [0, 0, 1, 1], [], []>} : vector<8x8xf32>, vector<8x256xf32>, vector<8x256xf32> -> vector<8x256xf32>
    %88 = arith.addf %84, %87 : vector<8x256xf32>
    %89 = vector.broadcast %57 : vector<8x1xf32> to vector<8x256xf32>
    %90 = arith.mulf %89, %88 : vector<8x256xf32>
    %91 = vector.broadcast %6 : vector<8x1xf32> to vector<8x256xf32>
    %92 = arith.addf %90, %91 : vector<8x256xf32>
    %cst_44 = arith.constant 0.000000e+00 : f32
    %93 = vector.broadcast %cst_44 : f32 to vector<8x256xf32>
    %94 = arith.maximumf %92, %93 : vector<8x256xf32>
    %cst_45 = arith.constant dense<0.000000e+00> : vector<8x256xf32>
    %95 = tpu.matmul %7, %0, %cst_45 {dimension_numbers = #tpu.dot_dimension_numbers<[1], [0], [0], [1], [0, 0, 1, 1], [], []>} : vector<8x4xf32>, vector<4x256xf32>, vector<8x256xf32> -> vector<8x256xf32>
    %96 = vector.broadcast %8 : vector<8x1xf32> to vector<8x256xf32>
    %97 = arith.addf %95, %96 : vector<8x256xf32>
    %98 = arith.addf %94, %97 : vector<8x256xf32>
    %cst_46 = arith.constant 0.000000e+00 : f32
    %99 = vector.broadcast %cst_46 : f32 to vector<8x256xf32>
    %100 = arith.maximumf %98, %99 : vector<8x256xf32>
    %c0_47 = arith.constant 0 : index
    %c0_48 = arith.constant 0 : index
    %c0_49 = arith.constant 0 : index
    %101 = vector.load %arg9[%c0_47, %c0_48, %c0_49] : memref<2x16x8xf32, #tpu.memory_space<vmem>>, vector<2x16x8xf32>
    %c0_50 = arith.constant 0 : index
    %c0_51 = arith.constant 0 : index
    %102 = vector.load %arg10[%c0_50, %c0_51] : memref<16x1xf32, #tpu.memory_space<vmem>>, vector<16x1xf32>
    %c0_52 = arith.constant 0 : index
    %c0_53 = arith.constant 0 : index
    %103 = vector.load %arg11[%c0_52, %c0_53] : memref<16x1xf32, #tpu.memory_space<vmem>>, vector<16x1xf32>
    %c0_54 = arith.constant 0 : index
    %c0_55 = arith.constant 0 : index
    %c0_56 = arith.constant 0 : index
    %104 = vector.load %arg12[%c0_54, %c0_55, %c0_56] : memref<2x16x16xf32, #tpu.memory_space<vmem>>, vector<2x16x16xf32>
    %c0_57 = arith.constant 0 : index
    %c0_58 = arith.constant 0 : index
    %105 = vector.load %arg13[%c0_57, %c0_58] : memref<16x1xf32, #tpu.memory_space<vmem>>, vector<16x1xf32>
    %c0_59 = arith.constant 0 : index
    %c0_60 = arith.constant 0 : index
    %106 = vector.load %arg14[%c0_59, %c0_60] : memref<16x1xf32, #tpu.memory_space<vmem>>, vector<16x1xf32>
    %c0_61 = arith.constant 0 : index
    %c0_62 = arith.constant 0 : index
    %107 = vector.load %arg15[%c0_61, %c0_62] : memref<16x8xf32, #tpu.memory_space<vmem>>, vector<16x8xf32>
    %c0_63 = arith.constant 0 : index
    %c0_64 = arith.constant 0 : index
    %108 = vector.load %arg16[%c0_63, %c0_64] : memref<16x1xf32, #tpu.memory_space<vmem>>, vector<16x1xf32>
    %109 = arith.mulf %101, %101 : vector<2x16x8xf32>
    %cst_65 = arith.constant dense<0.000000e+00> : vector<2x16xf32>
    %110 = vector.multi_reduction <add>, %109, %cst_65 [2] : vector<2x16x8xf32> to vector<2x16xf32>
    %111 = vector.shape_cast %110 : vector<2x16xf32> to vector<2x16x1xf32>
    %cst_66 = arith.constant dense<0.000000e+00> : vector<16x1xf32>
    %112 = vector.multi_reduction <add>, %111, %cst_66 [0] : vector<2x16x1xf32> to vector<16x1xf32>
    %113 = math.rsqrt %112 : vector<16x1xf32>
    %114 = arith.mulf %102, %113 : vector<16x1xf32>
    %115 = tpu.iota {dimensions = array<i32: 1>} : vector<8x256xi32>
    %c128_i32_67 = arith.constant 128 : i32
    %c0_i32_68 = arith.constant 0 : i32
    %116 = arith.cmpi eq, %c128_i32_67, %c0_i32_68 : i32
    %c1_i32_69 = arith.constant 1 : i32
    %117 = arith.select %116, %c1_i32_69, %c128_i32_67 : i32
    %118 = vector.broadcast %117 : i32 to vector<8x256xi32>
    %119 = arith.remsi %115, %118 : vector<8x256xi32>
    %c0_i32_70 = arith.constant 0 : i32
    %120 = vector.broadcast %c0_i32_70 : i32 to vector<8x256xi32>
    %121 = arith.cmpi ne, %119, %120 : vector<8x256xi32>
    %c0_i32_71 = arith.constant 0 : i32
    %122 = vector.broadcast %c0_i32_71 : i32 to vector<8x256xi32>
    %123 = arith.cmpi slt, %119, %122 : vector<8x256xi32>
    %c0_i32_72 = arith.constant 0 : i32
    %124 = arith.cmpi slt, %117, %c0_i32_72 : i32
    %125 = vector.broadcast %124 : i1 to vector<8x256xi1>
    %126 = vector.broadcast %125 : vector<8x256xi1> to vector<8x256xi1>
    %127 = arith.xori %123, %126 : vector<8x256xi1>
    %128 = arith.andi %127, %121 : vector<8x256xi1>
    %129 = vector.broadcast %117 : i32 to vector<8x256xi32>
    %130 = arith.addi %119, %129 : vector<8x256xi32>
    %131 = arith.select %128, %130, %119 : vector<8x256xi1>, vector<8x256xi32>
    %cst_73 = arith.constant 0.000000e+00 : f32
    %132 = vector.broadcast %cst_73 : f32 to vector<16x256xf32>
    %c2_i32 = arith.constant 2 : i32
    %133 = tpu.dynamic_rotate %100 by %c2_i32 dim 1 : vector<8x256xf32>, i32 -> vector<8x256xf32>
    %c2_i32_74 = arith.constant 2 : i32
    %134 = vector.broadcast %c2_i32_74 : i32 to vector<8x256xi32>
    %135 = arith.cmpi sge, %131, %134 : vector<8x256xi32>
    %cst_75 = arith.constant 0.000000e+00 : f32
    %136 = vector.broadcast %cst_75 : f32 to vector<8x256xf32>
    %137 = arith.select %135, %133, %136 : vector<8x256xi1>, vector<8x256xf32>
    %138 = vector.extract_strided_slice %101 {offsets = [0, 0, 0], sizes = [1, 16, 8], strides = [1, 1, 1]} : vector<2x16x8xf32> to vector<1x16x8xf32>
    %139 = vector.shape_cast %138 : vector<1x16x8xf32> to vector<16x8xf32>
    %cst_76 = arith.constant dense<0.000000e+00> : vector<16x256xf32>
    %140 = tpu.matmul %139, %137, %cst_76 {dimension_numbers = #tpu.dot_dimension_numbers<[1], [0], [0], [1], [0, 0, 1, 1], [], []>} : vector<16x8xf32>, vector<8x256xf32>, vector<16x256xf32> -> vector<16x256xf32>
    %141 = arith.addf %132, %140 : vector<16x256xf32>
    %142 = vector.extract_strided_slice %101 {offsets = [1, 0, 0], sizes = [1, 16, 8], strides = [1, 1, 1]} : vector<2x16x8xf32> to vector<1x16x8xf32>
    %143 = vector.shape_cast %142 : vector<1x16x8xf32> to vector<16x8xf32>
    %cst_77 = arith.constant dense<0.000000e+00> : vector<16x256xf32>
    %144 = tpu.matmul %143, %100, %cst_77 {dimension_numbers = #tpu.dot_dimension_numbers<[1], [0], [0], [1], [0, 0, 1, 1], [], []>} : vector<16x8xf32>, vector<8x256xf32>, vector<16x256xf32> -> vector<16x256xf32>
    %145 = arith.addf %141, %144 : vector<16x256xf32>
    %146 = vector.broadcast %114 : vector<16x1xf32> to vector<16x256xf32>
    %147 = arith.mulf %146, %145 : vector<16x256xf32>
    %148 = vector.broadcast %103 : vector<16x1xf32> to vector<16x256xf32>
    %149 = arith.addf %147, %148 : vector<16x256xf32>
    %cst_78 = arith.constant 0.000000e+00 : f32
    %150 = vector.broadcast %cst_78 : f32 to vector<16x256xf32>
    %151 = arith.maximumf %149, %150 : vector<16x256xf32>
    %152 = arith.mulf %104, %104 : vector<2x16x16xf32>
    %cst_79 = arith.constant dense<0.000000e+00> : vector<2x16xf32>
    %153 = vector.multi_reduction <add>, %152, %cst_79 [2] : vector<2x16x16xf32> to vector<2x16xf32>
    %154 = vector.shape_cast %153 : vector<2x16xf32> to vector<2x16x1xf32>
    %cst_80 = arith.constant dense<0.000000e+00> : vector<16x1xf32>
    %155 = vector.multi_reduction <add>, %154, %cst_80 [0] : vector<2x16x1xf32> to vector<16x1xf32>
    %156 = math.rsqrt %155 : vector<16x1xf32>
    %157 = arith.mulf %105, %156 : vector<16x1xf32>
    %158 = tpu.iota {dimensions = array<i32: 1>} : vector<16x256xi32>
    %c128_i32_81 = arith.constant 128 : i32
    %c0_i32_82 = arith.constant 0 : i32
    %159 = arith.cmpi eq, %c128_i32_81, %c0_i32_82 : i32
    %c1_i32_83 = arith.constant 1 : i32
    %160 = arith.select %159, %c1_i32_83, %c128_i32_81 : i32
    %161 = vector.broadcast %160 : i32 to vector<16x256xi32>
    %162 = arith.remsi %158, %161 : vector<16x256xi32>
    %c0_i32_84 = arith.constant 0 : i32
    %163 = vector.broadcast %c0_i32_84 : i32 to vector<16x256xi32>
    %164 = arith.cmpi ne, %162, %163 : vector<16x256xi32>
    %c0_i32_85 = arith.constant 0 : i32
    %165 = vector.broadcast %c0_i32_85 : i32 to vector<16x256xi32>
    %166 = arith.cmpi slt, %162, %165 : vector<16x256xi32>
    %c0_i32_86 = arith.constant 0 : i32
    %167 = arith.cmpi slt, %160, %c0_i32_86 : i32
    %168 = vector.broadcast %167 : i1 to vector<16x256xi1>
    %169 = vector.broadcast %168 : vector<16x256xi1> to vector<16x256xi1>
    %170 = arith.xori %166, %169 : vector<16x256xi1>
    %171 = arith.andi %170, %164 : vector<16x256xi1>
    %172 = vector.broadcast %160 : i32 to vector<16x256xi32>
    %173 = arith.addi %162, %172 : vector<16x256xi32>
    %174 = arith.select %171, %173, %162 : vector<16x256xi1>, vector<16x256xi32>
    %cst_87 = arith.constant 0.000000e+00 : f32
    %175 = vector.broadcast %cst_87 : f32 to vector<16x256xf32>
    %c2_i32_88 = arith.constant 2 : i32
    %176 = tpu.dynamic_rotate %151 by %c2_i32_88 dim 1 : vector<16x256xf32>, i32 -> vector<16x256xf32>
    %c2_i32_89 = arith.constant 2 : i32
    %177 = vector.broadcast %c2_i32_89 : i32 to vector<16x256xi32>
    %178 = arith.cmpi sge, %174, %177 : vector<16x256xi32>
    %cst_90 = arith.constant 0.000000e+00 : f32
    %179 = vector.broadcast %cst_90 : f32 to vector<16x256xf32>
    %180 = arith.select %178, %176, %179 : vector<16x256xi1>, vector<16x256xf32>
    %181 = vector.extract_strided_slice %104 {offsets = [0, 0, 0], sizes = [1, 16, 16], strides = [1, 1, 1]} : vector<2x16x16xf32> to vector<1x16x16xf32>
    %182 = vector.shape_cast %181 : vector<1x16x16xf32> to vector<16x16xf32>
    %cst_91 = arith.constant dense<0.000000e+00> : vector<16x256xf32>
    %183 = tpu.matmul %182, %180, %cst_91 {dimension_numbers = #tpu.dot_dimension_numbers<[1], [0], [0], [1], [0, 0, 1, 1], [], []>} : vector<16x16xf32>, vector<16x256xf32>, vector<16x256xf32> -> vector<16x256xf32>
    %184 = arith.addf %175, %183 : vector<16x256xf32>
    %185 = vector.extract_strided_slice %104 {offsets = [1, 0, 0], sizes = [1, 16, 16], strides = [1, 1, 1]} : vector<2x16x16xf32> to vector<1x16x16xf32>
    %186 = vector.shape_cast %185 : vector<1x16x16xf32> to vector<16x16xf32>
    %cst_92 = arith.constant dense<0.000000e+00> : vector<16x256xf32>
    %187 = tpu.matmul %186, %151, %cst_92 {dimension_numbers = #tpu.dot_dimension_numbers<[1], [0], [0], [1], [0, 0, 1, 1], [], []>} : vector<16x16xf32>, vector<16x256xf32>, vector<16x256xf32> -> vector<16x256xf32>
    %188 = arith.addf %184, %187 : vector<16x256xf32>
    %189 = vector.broadcast %157 : vector<16x1xf32> to vector<16x256xf32>
    %190 = arith.mulf %189, %188 : vector<16x256xf32>
    %191 = vector.broadcast %106 : vector<16x1xf32> to vector<16x256xf32>
    %192 = arith.addf %190, %191 : vector<16x256xf32>
    %cst_93 = arith.constant 0.000000e+00 : f32
    %193 = vector.broadcast %cst_93 : f32 to vector<16x256xf32>
    %194 = arith.maximumf %192, %193 : vector<16x256xf32>
    %cst_94 = arith.constant dense<0.000000e+00> : vector<16x256xf32>
    %195 = tpu.matmul %107, %100, %cst_94 {dimension_numbers = #tpu.dot_dimension_numbers<[1], [0], [0], [1], [0, 0, 1, 1], [], []>} : vector<16x8xf32>, vector<8x256xf32>, vector<16x256xf32> -> vector<16x256xf32>
    %196 = vector.broadcast %108 : vector<16x1xf32> to vector<16x256xf32>
    %197 = arith.addf %195, %196 : vector<16x256xf32>
    %198 = arith.addf %194, %197 : vector<16x256xf32>
    %cst_95 = arith.constant 0.000000e+00 : f32
    %199 = vector.broadcast %cst_95 : f32 to vector<16x256xf32>
    %200 = arith.maximumf %198, %199 : vector<16x256xf32>
    %c0_96 = arith.constant 0 : index
    %c0_97 = arith.constant 0 : index
    %c0_98 = arith.constant 0 : index
    %201 = vector.load %arg17[%c0_96, %c0_97, %c0_98] : memref<2x16x16xf32, #tpu.memory_space<vmem>>, vector<2x16x16xf32>
    %c0_99 = arith.constant 0 : index
    %c0_100 = arith.constant 0 : index
    %202 = vector.load %arg18[%c0_99, %c0_100] : memref<16x1xf32, #tpu.memory_space<vmem>>, vector<16x1xf32>
    %c0_101 = arith.constant 0 : index
    %c0_102 = arith.constant 0 : index
    %203 = vector.load %arg19[%c0_101, %c0_102] : memref<16x1xf32, #tpu.memory_space<vmem>>, vector<16x1xf32>
    %c0_103 = arith.constant 0 : index
    %c0_104 = arith.constant 0 : index
    %c0_105 = arith.constant 0 : index
    %204 = vector.load %arg20[%c0_103, %c0_104, %c0_105] : memref<2x16x16xf32, #tpu.memory_space<vmem>>, vector<2x16x16xf32>
    %c0_106 = arith.constant 0 : index
    %c0_107 = arith.constant 0 : index
    %205 = vector.load %arg21[%c0_106, %c0_107] : memref<16x1xf32, #tpu.memory_space<vmem>>, vector<16x1xf32>
    %c0_108 = arith.constant 0 : index
    %c0_109 = arith.constant 0 : index
    %206 = vector.load %arg22[%c0_108, %c0_109] : memref<16x1xf32, #tpu.memory_space<vmem>>, vector<16x1xf32>
    %207 = arith.mulf %201, %201 : vector<2x16x16xf32>
    %cst_110 = arith.constant dense<0.000000e+00> : vector<2x16xf32>
    %208 = vector.multi_reduction <add>, %207, %cst_110 [2] : vector<2x16x16xf32> to vector<2x16xf32>
    %209 = vector.shape_cast %208 : vector<2x16xf32> to vector<2x16x1xf32>
    %cst_111 = arith.constant dense<0.000000e+00> : vector<16x1xf32>
    %210 = vector.multi_reduction <add>, %209, %cst_111 [0] : vector<2x16x1xf32> to vector<16x1xf32>
    %211 = math.rsqrt %210 : vector<16x1xf32>
    %212 = arith.mulf %202, %211 : vector<16x1xf32>
    %213 = tpu.iota {dimensions = array<i32: 1>} : vector<16x256xi32>
    %c128_i32_112 = arith.constant 128 : i32
    %c0_i32_113 = arith.constant 0 : i32
    %214 = arith.cmpi eq, %c128_i32_112, %c0_i32_113 : i32
    %c1_i32_114 = arith.constant 1 : i32
    %215 = arith.select %214, %c1_i32_114, %c128_i32_112 : i32
    %216 = vector.broadcast %215 : i32 to vector<16x256xi32>
    %217 = arith.remsi %213, %216 : vector<16x256xi32>
    %c0_i32_115 = arith.constant 0 : i32
    %218 = vector.broadcast %c0_i32_115 : i32 to vector<16x256xi32>
    %219 = arith.cmpi ne, %217, %218 : vector<16x256xi32>
    %c0_i32_116 = arith.constant 0 : i32
    %220 = vector.broadcast %c0_i32_116 : i32 to vector<16x256xi32>
    %221 = arith.cmpi slt, %217, %220 : vector<16x256xi32>
    %c0_i32_117 = arith.constant 0 : i32
    %222 = arith.cmpi slt, %215, %c0_i32_117 : i32
    %223 = vector.broadcast %222 : i1 to vector<16x256xi1>
    %224 = vector.broadcast %223 : vector<16x256xi1> to vector<16x256xi1>
    %225 = arith.xori %221, %224 : vector<16x256xi1>
    %226 = arith.andi %225, %219 : vector<16x256xi1>
    %227 = vector.broadcast %215 : i32 to vector<16x256xi32>
    %228 = arith.addi %217, %227 : vector<16x256xi32>
    %229 = arith.select %226, %228, %217 : vector<16x256xi1>, vector<16x256xi32>
    %cst_118 = arith.constant 0.000000e+00 : f32
    %230 = vector.broadcast %cst_118 : f32 to vector<16x256xf32>
    %c4_i32 = arith.constant 4 : i32
    %231 = tpu.dynamic_rotate %200 by %c4_i32 dim 1 : vector<16x256xf32>, i32 -> vector<16x256xf32>
    %c4_i32_119 = arith.constant 4 : i32
    %232 = vector.broadcast %c4_i32_119 : i32 to vector<16x256xi32>
    %233 = arith.cmpi sge, %229, %232 : vector<16x256xi32>
    %cst_120 = arith.constant 0.000000e+00 : f32
    %234 = vector.broadcast %cst_120 : f32 to vector<16x256xf32>
    %235 = arith.select %233, %231, %234 : vector<16x256xi1>, vector<16x256xf32>
    %236 = vector.extract_strided_slice %201 {offsets = [0, 0, 0], sizes = [1, 16, 16], strides = [1, 1, 1]} : vector<2x16x16xf32> to vector<1x16x16xf32>
    %237 = vector.shape_cast %236 : vector<1x16x16xf32> to vector<16x16xf32>
    %cst_121 = arith.constant dense<0.000000e+00> : vector<16x256xf32>
    %238 = tpu.matmul %237, %235, %cst_121 {dimension_numbers = #tpu.dot_dimension_numbers<[1], [0], [0], [1], [0, 0, 1, 1], [], []>} : vector<16x16xf32>, vector<16x256xf32>, vector<16x256xf32> -> vector<16x256xf32>
    %239 = arith.addf %230, %238 : vector<16x256xf32>
    %240 = vector.extract_strided_slice %201 {offsets = [1, 0, 0], sizes = [1, 16, 16], strides = [1, 1, 1]} : vector<2x16x16xf32> to vector<1x16x16xf32>
    %241 = vector.shape_cast %240 : vector<1x16x16xf32> to vector<16x16xf32>
    %cst_122 = arith.constant dense<0.000000e+00> : vector<16x256xf32>
    %242 = tpu.matmul %241, %200, %cst_122 {dimension_numbers = #tpu.dot_dimension_numbers<[1], [0], [0], [1], [0, 0, 1, 1], [], []>} : vector<16x16xf32>, vector<16x256xf32>, vector<16x256xf32> -> vector<16x256xf32>
    %243 = arith.addf %239, %242 : vector<16x256xf32>
    %244 = vector.broadcast %212 : vector<16x1xf32> to vector<16x256xf32>
    %245 = arith.mulf %244, %243 : vector<16x256xf32>
    %246 = vector.broadcast %203 : vector<16x1xf32> to vector<16x256xf32>
    %247 = arith.addf %245, %246 : vector<16x256xf32>
    %cst_123 = arith.constant 0.000000e+00 : f32
    %248 = vector.broadcast %cst_123 : f32 to vector<16x256xf32>
    %249 = arith.maximumf %247, %248 : vector<16x256xf32>
    %250 = arith.mulf %204, %204 : vector<2x16x16xf32>
    %cst_124 = arith.constant dense<0.000000e+00> : vector<2x16xf32>
    %251 = vector.multi_reduction <add>, %250, %cst_124 [2] : vector<2x16x16xf32> to vector<2x16xf32>
    %252 = vector.shape_cast %251 : vector<2x16xf32> to vector<2x16x1xf32>
    %cst_125 = arith.constant dense<0.000000e+00> : vector<16x1xf32>
    %253 = vector.multi_reduction <add>, %252, %cst_125 [0] : vector<2x16x1xf32> to vector<16x1xf32>
    %254 = math.rsqrt %253 : vector<16x1xf32>
    %255 = arith.mulf %205, %254 : vector<16x1xf32>
    %256 = tpu.iota {dimensions = array<i32: 1>} : vector<16x256xi32>
    %c128_i32_126 = arith.constant 128 : i32
    %c0_i32_127 = arith.constant 0 : i32
    %257 = arith.cmpi eq, %c128_i32_126, %c0_i32_127 : i32
    %c1_i32_128 = arith.constant 1 : i32
    %258 = arith.select %257, %c1_i32_128, %c128_i32_126 : i32
    %259 = vector.broadcast %258 : i32 to vector<16x256xi32>
    %260 = arith.remsi %256, %259 : vector<16x256xi32>
    %c0_i32_129 = arith.constant 0 : i32
    %261 = vector.broadcast %c0_i32_129 : i32 to vector<16x256xi32>
    %262 = arith.cmpi ne, %260, %261 : vector<16x256xi32>
    %c0_i32_130 = arith.constant 0 : i32
    %263 = vector.broadcast %c0_i32_130 : i32 to vector<16x256xi32>
    %264 = arith.cmpi slt, %260, %263 : vector<16x256xi32>
    %c0_i32_131 = arith.constant 0 : i32
    %265 = arith.cmpi slt, %258, %c0_i32_131 : i32
    %266 = vector.broadcast %265 : i1 to vector<16x256xi1>
    %267 = vector.broadcast %266 : vector<16x256xi1> to vector<16x256xi1>
    %268 = arith.xori %264, %267 : vector<16x256xi1>
    %269 = arith.andi %268, %262 : vector<16x256xi1>
    %270 = vector.broadcast %258 : i32 to vector<16x256xi32>
    %271 = arith.addi %260, %270 : vector<16x256xi32>
    %272 = arith.select %269, %271, %260 : vector<16x256xi1>, vector<16x256xi32>
    %cst_132 = arith.constant 0.000000e+00 : f32
    %273 = vector.broadcast %cst_132 : f32 to vector<16x256xf32>
    %c4_i32_133 = arith.constant 4 : i32
    %274 = tpu.dynamic_rotate %249 by %c4_i32_133 dim 1 : vector<16x256xf32>, i32 -> vector<16x256xf32>
    %c4_i32_134 = arith.constant 4 : i32
    %275 = vector.broadcast %c4_i32_134 : i32 to vector<16x256xi32>
    %276 = arith.cmpi sge, %272, %275 : vector<16x256xi32>
    %cst_135 = arith.constant 0.000000e+00 : f32
    %277 = vector.broadcast %cst_135 : f32 to vector<16x256xf32>
    %278 = arith.select %276, %274, %277 : vector<16x256xi1>, vector<16x256xf32>
    %279 = vector.extract_strided_slice %204 {offsets = [0, 0, 0], sizes = [1, 16, 16], strides = [1, 1, 1]} : vector<2x16x16xf32> to vector<1x16x16xf32>
    %280 = vector.shape_cast %279 : vector<1x16x16xf32> to vector<16x16xf32>
    %cst_136 = arith.constant dense<0.000000e+00> : vector<16x256xf32>
    %281 = tpu.matmul %280, %278, %cst_136 {dimension_numbers = #tpu.dot_dimension_numbers<[1], [0], [0], [1], [0, 0, 1, 1], [], []>} : vector<16x16xf32>, vector<16x256xf32>, vector<16x256xf32> -> vector<16x256xf32>
    %282 = arith.addf %273, %281 : vector<16x256xf32>
    %283 = vector.extract_strided_slice %204 {offsets = [1, 0, 0], sizes = [1, 16, 16], strides = [1, 1, 1]} : vector<2x16x16xf32> to vector<1x16x16xf32>
    %284 = vector.shape_cast %283 : vector<1x16x16xf32> to vector<16x16xf32>
    %cst_137 = arith.constant dense<0.000000e+00> : vector<16x256xf32>
    %285 = tpu.matmul %284, %249, %cst_137 {dimension_numbers = #tpu.dot_dimension_numbers<[1], [0], [0], [1], [0, 0, 1, 1], [], []>} : vector<16x16xf32>, vector<16x256xf32>, vector<16x256xf32> -> vector<16x256xf32>
    %286 = arith.addf %282, %285 : vector<16x256xf32>
    %287 = vector.broadcast %255 : vector<16x1xf32> to vector<16x256xf32>
    %288 = arith.mulf %287, %286 : vector<16x256xf32>
    %289 = vector.broadcast %206 : vector<16x1xf32> to vector<16x256xf32>
    %290 = arith.addf %288, %289 : vector<16x256xf32>
    %cst_138 = arith.constant 0.000000e+00 : f32
    %291 = vector.broadcast %cst_138 : f32 to vector<16x256xf32>
    %292 = arith.maximumf %290, %291 : vector<16x256xf32>
    %293 = arith.addf %292, %200 : vector<16x256xf32>
    %cst_139 = arith.constant 0.000000e+00 : f32
    %294 = vector.broadcast %cst_139 : f32 to vector<16x256xf32>
    %295 = arith.maximumf %293, %294 : vector<16x256xf32>
    %c0_140 = arith.constant 0 : index
    %c0_141 = arith.constant 0 : index
    %296 = vector.load %arg23[%c0_140, %c0_141] : memref<16x256xf32, #tpu.memory_space<vmem>>, vector<16x256xf32>
    tpu.vector_store %arg23[%c0_140, %c0_141], %295 {strides = array<i32>} : memref<16x256xf32, #tpu.memory_space<vmem>>, vector<16x256xf32>,
    return
  }
}

</mosaic_0001>

<bundles_post_ra>
// kernel: tpu_custom_call.1
= control target key start
LH: loop header
LB: loop body
LE: loop exit
PB: predicated region body
PF: predicated region fallthrough
CT: control target
= control target key end

     0   :  { %s2338_s0 = inlined_call_operand.vmem [shape: f32[4,256], index: 0, kind: input, shape index: {}]   ;;  %s2339_s1 = inlined_call_operand.vmem [shape: f32[2,8,4], index: 1, kind: input, shape index: {}]   ;;  %s2340_s2 = inlined_call_operand.vmem [shape: f32[8,1], index: 2, kind: input, shape index: {}]   ;;  %s2341_s3 = inlined_call_operand.vmem [shape: f32[8,1], index: 3, kind: input, shape index: {}]   ;;  %s2342_s4 = inlined_call_operand.vmem [shape: f32[2,8,8], index: 4, kind: input, shape index: {}]   ;;  %s2343_s5 = inlined_call_operand.vmem [shape: f32[8,1], index: 5, kind: input, shape index: {}]   ;;  %s2344_s6 = inlined_call_operand.vmem [shape: f32[8,1], index: 6, kind: input, shape index: {}]   ;;  %s2345_s7 = inlined_call_operand.vmem [shape: f32[8,4], index: 7, kind: input, shape index: {}]   ;;  %s2346_s8 = inlined_call_operand.vmem [shape: f32[8,1], index: 8, kind: input, shape index: {}]   ;;  %s2347_s9 = inlined_call_operand.vmem [shape: f32[2,16,8], index: 9, kind: input, shape index: {}]   ;;  %s2348_s10 = inlined_call_operand.vmem [shape: f32[16,1], index: 10, kind: input, shape index: {}]   ;;  %s2349_s11 = inlined_call_operand.vmem [shape: f32[16,1], index: 11, kind: input, shape index: {}]   ;;  %s2350_s12 = inlined_call_operand.vmem [shape: f32[2,16,16], index: 12, kind: input, shape index: {}]   ;;  %s2351_s13 = inlined_call_operand.vmem [shape: f32[16,1], index: 13, kind: input, shape index: {}]   ;;  %s2352_s14 = inlined_call_operand.vmem [shape: f32[16,1], index: 14, kind: input, shape index: {}]   ;;  %s2353_s15 = inlined_call_operand.vmem [shape: f32[16,8], index: 15, kind: input, shape index: {}]   ;;  %s2354_s16 = inlined_call_operand.vmem [shape: f32[16,1], index: 16, kind: input, shape index: {}]   ;;  %s2355_s17 = inlined_call_operand.vmem [shape: f32[2,16,16], index: 17, kind: input, shape index: {}]   ;;  %s2356_s18 = inlined_call_operand.vmem [shape: f32[16,1], index: 18, kind: input, shape index: {}]   ;;  %s2357_s19 = inlined_call_operand.vmem [shape: f32[16,1], index: 19, kind: input, shape index: {}]   ;;  %s2358_s20 = inlined_call_operand.vmem [shape: f32[2,16,16], index: 20, kind: input, shape index: {}]   ;;  %s2359_s21 = inlined_call_operand.vmem [shape: f32[16,1], index: 21, kind: input, shape index: {}]   ;;  %s2360_s22 = inlined_call_operand.vmem [shape: f32[16,1], index: 22, kind: input, shape index: {}]   ;;  %s2361_s23 = inlined_call_operand.hbm [shape: f32[16,256], index: 23, kind: output, shape index: {}]  }
   0x1   :  { %2365 = sst [smem:[#allocation5_spill]] %s2338_s0 }
   0x2   :  { %2366 = sst [smem:[#allocation6_spill]] %s2339_s1 }
   0x3   :  { %2367 = sst [smem:[#allocation7_spill]] %s2340_s2 }
   0x4   :  { %2368 = sst [smem:[#allocation8_spill]] %s2341_s3 }
   0x5   :  { %2369 = sst [smem:[#allocation9_spill]] %s2342_s4 }
   0x6   :  { %2370 = sst [smem:[#allocation10_spill]] %s2343_s5 }
   0x7   :  { %2371 = sst [smem:[#allocation11_spill]] %s2344_s6 }
   0x8   :  { %2372 = sst [smem:[#allocation12_spill]] %s2345_s7 }
   0x9   :  { %2373 = sst [smem:[#allocation13_spill]] %s2356_s18 }
   0xa   :  { %s2374_s24 = sld [smem:[#allocation5_spill]]  ;;  %s2375_s18 = sld [smem:[#allocation6_spill]]  ;;  %vm88_vm0 = vcmask 31744   ;;  %vm142_vm1 = vcmask 1043456  }
   0xb   :  { %s1869_s2 = smov 1  }
  0x10   :  { %v75_v0 = vld [vmem:[%s2374_s24] sm:$0xff]  ;;  %v77_v2 = vld [vmem:[%s2375_s18 + $0x8] sm:$0xff] }
  0x11   :  { %v76_v1 = vld [vmem:[%s2375_s18] sm:$0xff]  ;;  %128 = vrot.lane.b32.xlu0 %v75_v0, %s1869_s2  ;;  %v126_v3 = vcombine.high %v75_v0, %v75_v0  ;;  %v87_v5 = vmul.f32 %v77_v2, %v77_v2 }
  0x12   :  { %v86_v4 = vmul.f32 %v76_v1, %v76_v1 }
  0x13   :  { %28 = vsyncpa [#allocation3], 0  ;;  %v1870_v6 = vmov 0.0   ;;  %1689 = vmatprep.subr.msk.mxu0 %vm142_vm1, %v126_v3  ;;  %v1871_v8 = vmov 0   ;;  %v92_v9 = vsel %vm88_vm0, %v87_v5, 0.0  ;;  %s2376_s27 = sld [smem:[#allocation8_spill]]  ;;  %v98_v15 = vlaneseq }
  0x14   :  { %211 = vmatprep.mubr.f32.mxu0 %v1870_v6  ;;  %401 = vmatprep.mubr.f32.mxu1 %v1870_v6  ;;  %v89_v7 = vsel %vm88_vm0, %v86_v4, 0.0  ;;  %s2377_s29 = sld [smem:[#allocation9_spill]]  ;;  %vm316_vm2 = vcmask 64512   ;;  %s2378_s4 = sld [smem:[#allocation11_spill]]  ;;  %v85_v57 = vld [vmem:[%s2346_s8] sm:$0xff]  ;;  %vm836_vm9 = vcmask 130048  }
  0x15   :  { %1793 = vset.pattern.permute.xlu1 %v1871_v8  ;;  %1690 = vmatpush1.msk.msra.mxu0 %vm142_vm1, %v75_v0  ;;  %v2026_v16 = vand.u32 127, %v98_v15  ;;  %s2379_s25 = sld [smem:[#allocation7_spill]]  ;;  %s2380_s26 = sld [smem:[#allocation12_spill]] }
  0x16   :  { %90 = vadd.xlane.f32.xlu1 %v89_v7  ;;  %130 = vrot.lane.b32.xlu0 %v126_v3, %s1869_s2  ;;  %s2381_s7 = sld [smem:[#allocation10_spill]]  ;;  %s1872_s3 = smov 2  }
  0x17   :  { %1691 = vmatmul.mubr.msk.f32.vlgmr.msra.gmra.mrb[0].mxu0 %vm88_vm0, %v77_v2  ;;  %1792 = vset.pattern.permute.xlu0 %v1871_v8  ;;  %v100_v17 = vadd.s32 128, %v2026_v16  ;;  %vm132_vm3 = vcmp.lt.s32.totalorder %v2026_v16, 1  ;;  %vm135_vm4 = vcmp.ge.s32.totalorder %v2026_v16, 1  ;;  %vm627_vm6 = vcmp.lt.s32.totalorder %v2026_v16, 2  ;;  %s2386_s24 = sld [smem:[#allocation13_spill]] }
  0x18   :  { %291 = vmatprep.mubr.f32.mxu0 %v1870_v6  ;;  %vm630_vm8 = vcmp.ge.s32.totalorder %v2026_v16, 2  ;;  %vm1216_vm12 = vcmp.lt.s32.totalorder %v2026_v16, 4  ;;  %vm1221_vm14 = vcmp.ge.s32.totalorder %v2026_v16, 4 }
  0x19   :  { %v79_v10 = vld [vmem:[%s2376_s27] sm:$0xff]  ;;  %v2029_v18 = vand.u32 127, %v100_v17  ;;  %vm1742_vm11 = vmpackc.low %vm630_vm8, %vm630_vm8 }
  0x1a   :  { %93 = vadd.xlane.f32.xlu1 %v92_v9  ;;  %v81_v11 = vld [vmem:[%s2377_s29 + $0x8] sm:$0xff]  ;;  %v83_v14 = vld [vmem:[%s2378_s4] sm:$0xff] }
  0x1b   :  { %v315_v12 = vmul.f32 %v81_v11, %v81_v11  ;;  %vm136_vm5 = vcmp.ge.s32.totalorder %v2029_v18, 1  ;;  %v78_v28 = vld [vmem:[%s2379_s25] sm:$0xff]  ;;  %vm631_vm7 = vcmp.ge.s32.totalorder %v2029_v18, 2  ;;  %vm1222_vm13 = vcmp.ge.s32.totalorder %v2029_v18, 4 }
  0x1c   :  { %v84_v31 = vld [vmem:[%s2380_s26] sm:$0xff]  ;;  %vm1739_vm10 = vmpackc.low %vm631_vm7, %vm631_vm7 }
  0x1d   :  { %v320_v13 = vsel %vm316_vm2, %v315_v12, 0.0  ;;  %v80_v42 = vld [vmem:[%s2377_s29] sm:$0xff]  ;;  %v583_v12 = vld [vmem:[%s2347_s9 + $0x10] sm:$0xff]  ;;  %vm2246_vm15 = vmpackc.low %vm1222_vm13, %vm1222_vm13 }
  0x1e   :  { %v314_v43 = vmul.f32 %v80_v42, %v80_v42  ;;  %v82_v52 = vld [vmem:[%s2381_s7] sm:$0xff] }
  0x1f   :  { %v581_v17 = vld [vmem:[%s2347_s9] sm:$0xff] }
  0x20   :  { %v317_v44 = vsel %vm316_vm2, %v314_v43, 0.0  ;;  %v587_v43 = vld [vmem:[%s2349_s11] sm:$0xff] }
  0x2b   :  { %307 = vperm.xlu1 %1793, %v79_v10  }
  0x4f   :  { %321 = vadd.xlane.f32.xlu1 %v320_v13  ;;  %v584_v13 = vld [vmem:[%s2347_s9 + $0x18] sm:$0xff] }
  0x60   :  { %491 = vperm.xlu1 %1793, %v83_v14   ;;  %v582_v14 = vld [vmem:[%s2347_s9 + $0x8] sm:$0xff] }
  0x61   :  { %v602_v15 = vmul.f32 %v582_v14, %v582_v14 }
  0x83   :  { %v129_v19 = vpop.permute.xlu0 %128 }
  0x88   :  { %v131_v20 = vpop.permute.xlu0 %130 }
  0x89   :  { %v133_v21 = vsel %vm132_vm3, %v129_v19, %v131_v20  ;;  %v134_v22 = vsel %vm132_vm3, %v131_v20, %v129_v19  ;;  %v608_v19 = vsel %vm316_vm2, %v602_v15, 0.0  ;;  %v601_v20 = vmul.f32 %v581_v17, %v581_v17 }
  0x8a   :  { %v137_v23 = vsel %vm135_vm4, %v134_v22, 0.0  ;;  %v138_v24 = vsel %vm136_vm5, %v133_v21, 0.0  ;;  %v603_v21 = vmul.f32 %v583_v12, %v583_v12 }
  0x8b   :  { %1692 = vmatprep.subr.msk.mxu0 %vm142_vm1, %v138_v24  ;;  %v605_v22 = vsel %vm316_vm2, %v601_v20, 0.0  ;;  %v604_v24 = vmul.f32 %v584_v13, %v584_v13 }
  0x8c   :  { %1693 = vmatpush1.msk.msra.mxu0 %vm142_vm1, %v137_v23  ;;  %v611_v23 = vsel %vm316_vm2, %v603_v21, 0.0 }
  0x8d   :  { %1694 = vmatmul.mubr.msk.f32.vlgmr.msra.gmra.mrb[0].mxu0 %vm88_vm0, %v76_v1  ;;  %1699 = vmatprep.subr.msk.mxu0 %vm142_vm1, %v126_v3 }
  0x8e   :  { %1700 = vmatpush1.msk.msra.mxu0 %vm142_vm1, %v75_v0  ;;  %570 = vmatprep.mubr.f32.mxu0 %v1870_v6 }
  0x91   :  { %1701 = vmatmul.mubr.msk.f32.vlgmr.msra.gmra.mrb[2].mxu0 %vm88_vm0, %v84_v31  ;;  %vm2250_vm0 = vmpackc.low %vm1221_vm14, %vm1221_vm14 }
  0x92   :  { %941 = vmatprep.mubr.f32.mxu0 %v1870_v6 }
  0xa3   :  { %v91_v25 = vpop.xlane.xlu1 %90 }
  0xa7   :  { %v94_v26 = vpop.xlane.xlu1 %93 }
  0xa8   :  { %v95_v27 = vadd.f32 %v94_v26, %v91_v25  ;;  %v614_v25 = vsel %vm316_vm2, %v604_v24, 0.0 }
  0xaa   :  { %1825 = vrsqrt.f32 %v95_v27 }
  0xab   :  { %v308_v36 = vpop.permute.xlu1 %307 }
  0xb4   :  { %v1826_v29 = vpop.eup %1825 }
  0xb5   :  { %v97_v30 = vmul.f32 %v1826_v29, %v78_v28 }
  0xb7   :  { %300 = vperm.xlu0 %1792, %v97_v30  }
  0xdc   :  { %v322_v49 = vpop.xlane.xlu1 %321 }
  0xe0   :  { %v492_v62 = vpop.permute.xlu1 %491 }
 0x136   :  { %v301_v32 = vpop.permute.xlu0 %300 }
 0x160   :  { %v293_v33 = vpop.f32.mrb[0].mxu0 }
 0x161   :  { %v303_v34 = vmul.f32 %v301_v32, %v293_v33  ;;  %v295_v35 = vpop.f32.mrb[1].mxu0 }
 0x162   :  { %v304_v37 = vmul.f32 %v301_v32, %v295_v35 }
 0x163   :  { %v310_v38 = vadd.f32 %v308_v36, %v303_v34 }
 0x164   :  { %v311_v39 = vadd.f32 %v308_v36, %v304_v37  ;;  %v572_v55 = vpop.f32.mrb[2].mxu0  ;;  %v585_v36 = vld [vmem:[%s2348_s10] sm:$0xff] }
 0x165   :  { %v312_v40 = vmax.f32 %v310_v38, 0.0  ;;  %v574_v56 = vpop.f32.mrb[3].mxu0 }
 0x166   :  { %v313_v41 = vmax.f32 %v311_v39, 0.0  ;;  %v586_v39 = vld [vmem:[%s2348_s10 + $0x8] sm:$0xff] }
 0x167   :  { %326 = vrot.lane.b32.xlu0 %v312_v40, %s1869_s2 }
 0x168   :  { %337 = vmatprep.subr.mxu1 %v313_v41 }
 0x169   :  { %338 = vmatpush1.msra.mxu1 %v312_v40 }
 0x16a   :  { %1695 = vmatmul.mubr.msk.f32.vlgmr.msra.gmra.mrb[0].mxu1 %vm316_vm2, %v81_v11 }
 0x16b   :  { %328 = vrot.lane.b32.xlu0 %v313_v41, %s1869_s2  ;;  %475 = vmatprep.mubr.f32.mxu1 %v1870_v6  ;;  %v588_v41 = vld [vmem:[%s2349_s11 + $0x8] sm:$0xff] }
 0x18a   :  { %318 = vadd.xlane.f32.xlu0 %v317_v44  ;;  %v597_v44 = vld [vmem:[%s2353_s15] sm:$0xff] }
 0x1d9   :  { %v327_v45 = vpop.permute.xlu0 %326 }
 0x1dd   :  { %v329_v46 = vpop.permute.xlu0 %328 }
 0x1de   :  { %v330_v47 = vsel %vm132_vm3, %v327_v45, %v329_v46  ;;  %v331_v48 = vsel %vm132_vm3, %v329_v46, %v327_v45 }
 0x1df   :  { %1696 = vmatprep.subr.msk.mxu1 %vm136_vm5, %v330_v47 }
 0x1e0   :  { %1697 = vmatpush1.msk.msra.mxu1 %vm135_vm4, %v331_v48  ;;  %v598_v48 = vld [vmem:[%s2353_s15 + $0x8] sm:$0xff] }
 0x1e1   :  { %1698 = vmatmul.mubr.msk.f32.vlgmr.msra.gmra.mrb[0].mxu1 %vm316_vm2, %v80_v42 }
 0x1e2   :  { %704 = vmatprep.mubr.f32.mxu1 %v1870_v6 }
 0x217   :  { %v319_v50 = vpop.xlane.xlu0 %318 }
 0x218   :  { %v323_v51 = vadd.f32 %v322_v49, %v319_v50 }
 0x21a   :  { %1827 = vrsqrt.f32 %v323_v51 }
 0x224   :  { %v1828_v53 = vpop.eup %1827 }
 0x225   :  { %v325_v54 = vmul.f32 %v1828_v53, %v82_v52 }
 0x227   :  { %484 = vperm.xlu0 %1792, %v325_v54  }
 0x22b   :  { %500 = vperm.xlu0 %1792, %v85_v57  }
 0x2a6   :  { %v485_v58 = vpop.permute.xlu0 %484 }
 0x2aa   :  { %v501_v63 = vpop.permute.xlu0 %500 }
 0x2ab   :  { %v573_v3 = vadd.f32 %v572_v55, %v501_v63  ;;  %v575_v5 = vadd.f32 %v574_v56, %v501_v63 }
 0x2b4   :  { %v477_v59 = vpop.f32.mrb[0].mxu1 }
 0x2b5   :  { %v487_v60 = vmul.f32 %v485_v58, %v477_v59  ;;  %v479_v61 = vpop.f32.mrb[1].mxu1 }
 0x2b6   :  { %v488_v0 = vmul.f32 %v485_v58, %v479_v61 }
 0x2b7   :  { %v494_v1 = vadd.f32 %v492_v62, %v487_v60 }
 0x2b8   :  { %v495_v2 = vadd.f32 %v492_v62, %v488_v0 }
 0x2b9   :  { %v496_v4 = vmax.f32 %v494_v1, 0.0 }
 0x2ba   :  { %v497_v7 = vmax.f32 %v495_v2, 0.0 }
 0x2bb   :  { %v577_v8 = vadd.f32 %v573_v3, %v496_v4 }
 0x2bc   :  { %v578_v9 = vadd.f32 %v575_v5, %v497_v7  ;;  %v591_v7 = vld [vmem:[%s2350_s12 + $0x10] sm:$0xff] }
 0x2bd   :  { %v579_v10 = vmax.f32 %v577_v8, 0.0  ;;  %v592_v8 = vld [vmem:[%s2350_s12 + $0x18] sm:$0xff] }
 0x2be   :  { %v580_v11 = vmax.f32 %v578_v9, 0.0  ;;  %v590_v9 = vld [vmem:[%s2350_s12 + $0x8] sm:$0xff] }
 0x2bf   :  { %623 = vrot.lane.b32.xlu1 %v579_v10, %s1872_s3 }
 0x2c0   :  { %625 = vrot.lane.b32.xlu0 %v580_v11, %s1872_s3  ;;  %640 = vmatprep.subr.mxu1 %v580_v11 }
 0x2c1   :  { %641 = vmatpush1.msra.mxu1 %v579_v10 }
 0x2c2   :  { %1702 = vmatmul.mubr.msk.f32.vlgmr.msra.gmra.mrb[2].mxu1 %vm316_vm2, %v583_v12 }
 0x2c3   :  { %710 = vmatprep.mubr.f32.mxu1 %v1870_v6 }
 0x2c6   :  { %1703 = vmatmul.mubr.msk.f32.gmra.mrb[4].mxu1 %vm316_vm2, %v584_v13 }
 0x2c7   :  { %787 = vmatprep.mubr.f32.mxu1 %v1870_v6 }
 0x2df   :  { %609 = vadd.xlane.f32.xlu0 %v608_v19  ;;  %v835_v19 = vmul.f32 %v592_v8, %v592_v8 }
 0x2e1   :  { %v846_v20 = vsel %vm836_vm9, %v835_v19, 0.0 }
 0x2e3   :  { %606 = vadd.xlane.f32.xlu1 %v605_v22  ;;  %612 = vadd.xlane.f32.xlu0 %v611_v23 }
 0x2e7   :  { %615 = vadd.xlane.f32.xlu1 %v614_v25 }
 0x331   :  { %v624_v26 = vpop.permute.xlu1 %623 }
 0x332   :  { %v626_v27 = vpop.permute.xlu0 %625 }
 0x333   :  { %v628_v28 = vsel %vm627_vm6, %v624_v26, %v626_v27  ;;  %v629_v29 = vsel %vm627_vm6, %v626_v27, %v624_v26 }
 0x334   :  { %1704 = vmatprep.subr.msk.mxu1 %vm631_vm7, %v628_v28 }
 0x335   :  { %1705 = vmatpush1.msk.msra.mxu1 %vm630_vm8, %v629_v29 }
 0x336   :  { %1706 = vmatmul.mubr.msk.f32.vlgmr.msra.gmra.mrb[2].mxu1 %vm316_vm2, %v581_v17  ;;  %1085 = vmatprep.subr.mxu1 %v580_v11  ;;  %v589_v11 = vld [vmem:[%s2350_s12] sm:$0xff] }
 0x337   :  { %1086 = vmatpush1.msra.mxu1 %v579_v10  ;;  %793 = vmatprep.mubr.f32.mxu1 %v1870_v6  ;;  %v833_v10 = vmul.f32 %v590_v9, %v590_v9  ;;  %v832_v13 = vmul.f32 %v589_v11, %v589_v11 }
 0x339   :  { %v840_v12 = vsel %vm836_vm9, %v833_v10, 0.0  ;;  %v837_v15 = vsel %vm836_vm9, %v832_v13, 0.0 }
 0x33a   :  { %1707 = vmatmul.mubr.msk.f32.gmra.mrb[4].mxu1 %vm316_vm2, %v582_v14  ;;  %v834_v14 = vmul.f32 %v591_v7, %v591_v7 }
 0x33b   :  { %1149 = vmatprep.mubr.f32.mxu1 %v1870_v6 }
 0x33c   :  { %v843_v17 = vsel %vm836_vm9, %v834_v14, 0.0 }
 0x33e   :  { %1716 = vmatmul.mubr.msk.f32.vlgmr.msra.gmra.mrb[6].mxu1 %vm316_vm2, %v597_v44  ;;  %v596_v44 = vld [vmem:[%s2352_s14 + $0x8] sm:$0xff] }
 0x33f   :  { %1155 = vmatprep.mubr.f32.mxu1 %v1870_v6 }
 0x342   :  { %1717 = vmatmul.mubr.msk.f32.gmra.mrb[8].mxu1 %vm316_vm2, %v598_v48  ;;  %v595_v48 = vld [vmem:[%s2352_s14] sm:$0xff]  ;;  %s1873_s14 = smov 4  }
 0x343   :  { %1533 = vmatprep.mubr.f32.mxu1 %v1870_v6 }
 0x36c   :  { %v610_v30 = vpop.xlane.xlu0 %609 }
 0x370   :  { %v607_v31 = vpop.xlane.xlu1 %606  ;;  %v613_v32 = vpop.xlane.xlu0 %612 }
 0x371   :  { %v617_v33 = vadd.f32 %v613_v32, %v607_v31 }
 0x373   :  { %1829 = vrsqrt.f32 %v617_v33 }
 0x374   :  { %v616_v34 = vpop.xlane.xlu1 %615 }
 0x375   :  { %v618_v35 = vadd.f32 %v616_v34, %v610_v30 }
 0x377   :  { %1831 = vrsqrt.f32 %v618_v35 }
 0x37d   :  { %v1830_v37 = vpop.eup %1829 }
 0x37e   :  { %v621_v38 = vmul.f32 %v1830_v37, %v585_v36 }
 0x380   :  { %802 = vperm.xlu0 %1792, %v621_v38  }
 0x381   :  { %v1832_v40 = vpop.eup %1831 }
 0x382   :  { %v622_v42 = vmul.f32 %v1832_v40, %v586_v39  ;;  %v593_v39 = vld [vmem:[%s2351_s13] sm:$0xff] }
 0x384   :  { %807 = vperm.xlu1 %1793, %v622_v42   ;;  %821 = vperm.xlu0 %1792, %v588_v41   ;;  %v594_v42 = vld [vmem:[%s2351_s13 + $0x8] sm:$0xff] }
 0x388   :  { %816 = vperm.xlu1 %1793, %v587_v43  }
 0x3ff   :  { %v803_v46 = vpop.permute.xlu0 %802 }
 0x403   :  { %v808_v45 = vpop.permute.xlu1 %807  ;;  %v822_v57 = vpop.permute.xlu0 %821 }
 0x407   :  { %v817_v52 = vpop.permute.xlu1 %816 }
 0x409   :  { %v789_v47 = vpop.f32.mrb[2].mxu1 }
 0x40a   :  { %v810_v49 = vmul.f32 %v803_v46, %v789_v47  ;;  %v791_v50 = vpop.f32.mrb[3].mxu1 }
 0x40b   :  { %v811_v51 = vmul.f32 %v803_v46, %v791_v50 }
 0x40c   :  { %v824_v54 = vadd.f32 %v817_v52, %v810_v49  ;;  %v600_v49 = vld [vmem:[%s2354_s16 + $0x8] sm:$0xff] }
 0x40d   :  { %v795_v53 = vpop.f32.mrb[4].mxu1  ;;  %v825_v58 = vadd.f32 %v817_v52, %v811_v51  ;;  %v599_v52 = vld [vmem:[%s2354_s16] sm:$0xff] }
 0x40e   :  { %v812_v55 = vmul.f32 %v808_v45, %v795_v53  ;;  %v797_v56 = vpop.f32.mrb[5].mxu1  ;;  %v828_v62 = vmax.f32 %v824_v54, 0.0 }
 0x40f   :  { %v813_v59 = vmul.f32 %v808_v45, %v797_v56  ;;  %v829_v0 = vmax.f32 %v825_v58, 0.0 }
 0x410   :  { %v826_v60 = vadd.f32 %v822_v57, %v812_v55 }
 0x411   :  { %v827_v61 = vadd.f32 %v822_v57, %v813_v59  ;;  %v1151_v46 = vpop.f32.mrb[6].mxu1 }
 0x412   :  { %v830_v63 = vmax.f32 %v826_v60, 0.0  ;;  %v1153_v47 = vpop.f32.mrb[7].mxu1 }
 0x413   :  { %v831_v1 = vmax.f32 %v827_v61, 0.0 }
 0x414   :  { %v1736_v2 = vpack.c.bf16 %v830_v63, %v828_v62  ;;  %v1794_v3 = vpack.i.bf16 %v830_v63, %v828_v62 }
 0x415   :  { %v1799_v4 = vpack.i.bf16 %v831_v1, %v829_v0  ;;  %v1734_v5 = vpack.c.bf16 %v831_v1, %v829_v0  ;;  %v1157_v50 = vpop.f32.mrb[8].mxu1 }
 0x416   :  { %1795 = vrot.lane.b32.xlu1 %v1794_v3, %s1872_s3  ;;  %v1159_v51 = vpop.f32.mrb[9].mxu1 }
 0x417   :  { %1800 = vrot.lane.b32.xlu0 %v1799_v4, %s1872_s3  ;;  %1735 = vmatprep.subr.bf16.mxu0 %v1734_v5 }
 0x418   :  { %1737 = vmatpush1.bf16.msra.mxu0 %v1736_v2 }
 0x41b   :  { %1708 = vmatmul.mubr.msk.f32.vlgmr.msra.gmra.mrb[4].mxu0 %vm836_vm9, %v591_v7 }
 0x41c   :  { %947 = vmatprep.mubr.f32.mxu0 %v1870_v6 }
 0x41f   :  { %1709 = vmatmul.mubr.msk.f32.gmra.mrb[6].mxu0 %vm836_vm9, %v592_v8 }
 0x420   :  { %1024 = vmatprep.mubr.f32.mxu0 %v1870_v6 }
 0x436   :  { %841 = vadd.xlane.f32.xlu0 %v840_v12 }
 0x43a   :  { %838 = vadd.xlane.f32.xlu1 %v837_v15  ;;  %844 = vadd.xlane.f32.xlu0 %v843_v17 }
 0x43e   :  { %847 = vadd.xlane.f32.xlu1 %v846_v20 }
 0x488   :  { %v1796_v21 = vpop.permute.xlu1 %1795 }
 0x489   :  { %v1798_v22 = vunpack.i.h.bf16 %v1796_v21  ;;  %v1797_v23 = vunpack.i.l.bf16 %v1796_v21  ;;  %v1801_v24 = vpop.permute.xlu0 %1800 }
 0x48a   :  { %v1803_v25 = vunpack.i.h.bf16 %v1801_v24  ;;  %v1802_v26 = vunpack.i.l.bf16 %v1801_v24 }
 0x48c   :  { %v864_v27 = vsel %vm627_vm6, %v1798_v22, %v1803_v25  ;;  %v866_v28 = vsel %vm627_vm6, %v1803_v25, %v1798_v22  ;;  %v863_v29 = vsel %vm627_vm6, %v1797_v23, %v1802_v26  ;;  %v865_v30 = vsel %vm627_vm6, %v1802_v26, %v1797_v23 }
 0x48d   :  { %v1738_v31 = vpack.c.bf16 %v864_v27, %v863_v29  ;;  %v1741_v32 = vpack.c.bf16 %v866_v28, %v865_v30  ;;  %v1172_v30 = vld [vmem:[%s2355_s17 + $0x10] sm:$0xff] }
 0x48f   :  { %1740 = vmatprep.subr.msk.bf16.mxu0 %vm1739_vm10, %v1738_v31  ;;  %v1173_v31 = vld [vmem:[%s2355_s17 + $0x18] sm:$0xff] }
 0x490   :  { %1743 = vmatpush1.bf16.msk.msra.mxu0 %vm1742_vm11, %v1741_v32  ;;  %v1171_v32 = vld [vmem:[%s2355_s17 + $0x8] sm:$0xff] }
 0x493   :  { %1714 = vmatmul.mubr.msk.f32.vlgmr.msra.gmra.mrb[4].mxu0 %vm836_vm9, %v589_v11 }
 0x494   :  { %1030 = vmatprep.mubr.f32.mxu0 %v1870_v6 }
 0x497   :  { %1715 = vmatmul.mubr.msk.f32.gmra.mrb[6].mxu0 %vm836_vm9, %v590_v9 }
 0x498   :  { %1297 = vmatprep.mubr.f32.mxu0 %v1870_v6 }
 0x4c3   :  { %v842_v33 = vpop.xlane.xlu0 %841 }
 0x4c7   :  { %v839_v34 = vpop.xlane.xlu1 %838  ;;  %v845_v35 = vpop.xlane.xlu0 %844 }
 0x4c8   :  { %v849_v36 = vadd.f32 %v845_v35, %v839_v34  ;;  %v1170_v34 = vld [vmem:[%s2355_s17] sm:$0xff] }
 0x4ca   :  { %1833 = vrsqrt.f32 %v849_v36  ;;  %v1186_v36 = vmul.f32 %v1170_v34, %v1170_v34 }
 0x4cb   :  { %v848_v37 = vpop.xlane.xlu1 %847 }
 0x4cc   :  { %v850_v38 = vadd.f32 %v848_v37, %v842_v33  ;;  %v1187_v33 = vmul.f32 %v1171_v32, %v1171_v32  ;;  %v1188_v37 = vmul.f32 %v1172_v30, %v1172_v30 }
 0x4ce   :  { %1835 = vrsqrt.f32 %v850_v38  ;;  %v1193_v35 = vsel %vm836_vm9, %v1187_v33, 0.0  ;;  %v1190_v38 = vsel %vm836_vm9, %v1186_v36, 0.0  ;;  %v1180_v36 = vld [vmem:[%s2358_s20 + $0x10] sm:$0xff] }
 0x4d4   :  { %v1834_v40 = vpop.eup %1833 }
 0x4d5   :  { %v853_v41 = vmul.f32 %v1834_v40, %v593_v39  ;;  %v1196_v39 = vsel %vm836_vm9, %v1188_v37, 0.0  ;;  %v1189_v40 = vmul.f32 %v1173_v31, %v1173_v31  ;;  %v1181_v37 = vld [vmem:[%s2358_s20 + $0x18] sm:$0xff] }
 0x4d7   :  { %1039 = vperm.xlu0 %1792, %v853_v41   ;;  %v1199_v41 = vsel %vm836_vm9, %v1189_v40, 0.0  ;;  %v1178_v40 = vld [vmem:[%s2358_s20] sm:$0xff] }
 0x4d8   :  { %v1836_v43 = vpop.eup %1835 }
 0x4d9   :  { %v854_v45 = vmul.f32 %v1836_v43, %v594_v42 }
 0x4db   :  { %1044 = vperm.xlu1 %1793, %v854_v45   ;;  %1058 = vperm.xlu0 %1792, %v596_v44  }
 0x4df   :  { %1053 = vperm.xlu1 %1793, %v595_v48   ;;  %1076 = vperm.xlu0 %1792, %v600_v49  }
 0x4e3   :  { %1071 = vperm.xlu1 %1793, %v599_v52   ;;  %v1182_v52 = vld [vmem:[%s2359_s21] sm:$0xff] }
 0x556   :  { %v1040_v54 = vpop.permute.xlu0 %1039 }
 0x55a   :  { %v1045_v53 = vpop.permute.xlu1 %1044  ;;  %v1059_v56 = vpop.permute.xlu0 %1058 }
 0x55e   :  { %v1054_v55 = vpop.permute.xlu1 %1053  ;;  %v1077_v5 = vpop.permute.xlu0 %1076 }
 0x55f   :  { %v1158_v14 = vadd.f32 %v1157_v50, %v1077_v5  ;;  %v1160_v17 = vadd.f32 %v1159_v51, %v1077_v5 }
 0x562   :  { %v1072_v60 = vpop.permute.xlu1 %1071 }
 0x563   :  { %v1152_v1 = vadd.f32 %v1151_v46, %v1072_v60  ;;  %v1154_v7 = vadd.f32 %v1153_v47, %v1072_v60 }
 0x566   :  { %v1026_v57 = vpop.f32.mrb[4].mxu0 }
 0x567   :  { %v1047_v58 = vmul.f32 %v1040_v54, %v1026_v57  ;;  %v1028_v59 = vpop.f32.mrb[5].mxu0 }
 0x568   :  { %v1048_v61 = vmul.f32 %v1040_v54, %v1028_v59 }
 0x569   :  { %v1061_v62 = vadd.f32 %v1054_v55, %v1047_v58 }
 0x56a   :  { %v1062_v63 = vadd.f32 %v1054_v55, %v1048_v61  ;;  %v1032_v0 = vpop.f32.mrb[6].mxu0  ;;  %v1174_v61 = vld [vmem:[%s2386_s24] sm:$0xff] }
 0x56b   :  { %v1065_v2 = vmax.f32 %v1061_v62, 0.0  ;;  %v1049_v3 = vmul.f32 %v1045_v53, %v1032_v0  ;;  %v1034_v4 = vpop.f32.mrb[7].mxu0  ;;  %v1175_v0 = vld [vmem:[%s2386_s24 + $0x8] sm:$0xff] }
 0x56c   :  { %v1066_v8 = vmax.f32 %v1062_v63, 0.0  ;;  %v1050_v9 = vmul.f32 %v1045_v53, %v1034_v4  ;;  %v1176_v4 = vld [vmem:[%s2357_s19] sm:$0xff] }
 0x56d   :  { %v1162_v10 = vadd.f32 %v1152_v1, %v1065_v2  ;;  %v1063_v11 = vadd.f32 %v1059_v56, %v1049_v3  ;;  %v1177_v2 = vld [vmem:[%s2357_s19 + $0x8] sm:$0xff] }
 0x56e   :  { %v1163_v12 = vadd.f32 %v1154_v7, %v1066_v8  ;;  %v1064_v13 = vadd.f32 %v1059_v56, %v1050_v9 }
 0x56f   :  { %v1067_v15 = vmax.f32 %v1063_v11, 0.0  ;;  %v2197_v22 = vmax.f32 %v1162_v10, 0.0 }
 0x570   :  { %v1068_v19 = vmax.f32 %v1064_v13, 0.0  ;;  %v2201_v24 = vmax.f32 %v1163_v12, 0.0 }
 0x571   :  { %v1164_v20 = vadd.f32 %v1158_v14, %v1067_v15 }
 0x572   :  { %v1165_v21 = vadd.f32 %v1160_v17, %v1068_v19 }
 0x573   :  { %v2199_v23 = vmax.f32 %v1164_v20, 0.0 }
 0x574   :  { %v2203_v25 = vmax.f32 %v1165_v21, 0.0 }
 0x575   :  { %v1804_v26 = vpack.i.bf16 %v2199_v23, %v2197_v22  ;;  %v1746_v29 = vpack.c.bf16 %v2199_v23, %v2197_v22 }
 0x576   :  { %v1809_v27 = vpack.i.bf16 %v2203_v25, %v2201_v24  ;;  %v1744_v28 = vpack.c.bf16 %v2203_v25, %v2201_v24 }
 0x577   :  { %1805 = vrot.lane.b32.xlu1 %v1804_v26, %s1873_s14 }
 0x578   :  { %1810 = vrot.lane.b32.xlu0 %v1809_v27, %s1873_s14  ;;  %1745 = vmatprep.subr.bf16.mxu0 %v1744_v28 }
 0x579   :  { %1747 = vmatpush1.bf16.msra.mxu0 %v1746_v29 }
 0x57c   :  { %1718 = vmatmul.mubr.msk.f32.vlgmr.msra.gmra.mrb[8].mxu0 %vm836_vm9, %v1172_v30 }
 0x57d   :  { %1303 = vmatprep.mubr.f32.mxu0 %v1870_v6 }
 0x580   :  { %1719 = vmatmul.mubr.msk.f32.gmra.mrb[10].mxu0 %vm836_vm9, %v1173_v31 }
 0x581   :  { %1380 = vmatprep.mubr.f32.mxu0 %v1870_v6 }
 0x597   :  { %1194 = vadd.xlane.f32.xlu0 %v1193_v35 }
 0x59b   :  { %1191 = vadd.xlane.f32.xlu1 %v1190_v38  ;;  %1197 = vadd.xlane.f32.xlu0 %v1196_v39  ;;  %v1179_v38 = vld [vmem:[%s2358_s20 + $0x8] sm:$0xff] }
 0x59c   :  { %v1426_v39 = vmul.f32 %v1179_v38, %v1179_v38 }
 0x59f   :  { %1200 = vadd.xlane.f32.xlu1 %v1199_v41  ;;  %v1432_v41 = vsel %vm836_vm9, %v1426_v39, 0.0 }
 0x5e9   :  { %v1806_v42 = vpop.permute.xlu1 %1805 }
 0x5ea   :  { %v1808_v43 = vunpack.i.h.bf16 %v1806_v42  ;;  %v1807_v44 = vunpack.i.l.bf16 %v1806_v42  ;;  %v1811_v45 = vpop.permute.xlu0 %1810  ;;  %v1425_v42 = vmul.f32 %v1178_v40, %v1178_v40 }
 0x5eb   :  { %v1813_v46 = vunpack.i.h.bf16 %v1811_v45  ;;  %v1812_v47 = vunpack.i.l.bf16 %v1811_v45 }
 0x5ed   :  { %v1218_v48 = vsel %vm1216_vm12, %v1808_v43, %v1813_v46  ;;  %v1220_v49 = vsel %vm1216_vm12, %v1813_v46, %v1808_v43  ;;  %v1217_v50 = vsel %vm1216_vm12, %v1807_v44, %v1812_v47  ;;  %v1219_v51 = vsel %vm1216_vm12, %v1812_v47, %v1807_v44 }
 0x5ee   :  { %v1748_v18 = vpack.c.bf16 %v1218_v48, %v1217_v50  ;;  %v1751_v53 = vpack.c.bf16 %v1220_v49, %v1219_v51  ;;  %v1427_v43 = vmul.f32 %v1180_v36, %v1180_v36  ;;  %v1429_v44 = vsel %vm836_vm9, %v1425_v42, 0.0 }
 0x5ef   :  { %v1428_v46 = vmul.f32 %v1181_v37, %v1181_v37 }
 0x5f0   :  { %1750 = vmatprep.subr.msk.bf16.mxu0 %vm2246_vm15, %v1748_v18  ;;  %v1435_v45 = vsel %vm836_vm9, %v1427_v43, 0.0 }
 0x5f1   :  { %1753 = vmatpush1.bf16.msk.msra.mxu0 %vm2250_vm0, %v1751_v53  ;;  %v1438_v47 = vsel %vm836_vm9, %v1428_v46, 0.0 }
 0x5f4   :  { %1724 = vmatmul.mubr.msk.f32.vlgmr.msra.gmra.mrb[8].mxu0 %vm836_vm9, %v1170_v34 }
 0x5f5   :  { %1386 = vmatprep.mubr.f32.mxu0 %v1870_v6 }
 0x5f8   :  { %1725 = vmatmul.mubr.msk.f32.gmra.mrb[10].mxu0 %vm836_vm9, %v1171_v32 }
 0x624   :  { %v1195_v55 = vpop.xlane.xlu0 %1194 }
 0x628   :  { %v1192_v56 = vpop.xlane.xlu1 %1191  ;;  %v1198_v57 = vpop.xlane.xlu0 %1197 }
 0x629   :  { %v1202_v58 = vadd.f32 %v1198_v57, %v1192_v56 }
 0x62b   :  { %1837 = vrsqrt.f32 %v1202_v58 }
 0x62c   :  { %v1201_v59 = vpop.xlane.xlu1 %1200 }
 0x62d   :  { %v1203_v60 = vadd.f32 %v1201_v59, %v1195_v55 }
 0x62f   :  { %1839 = vrsqrt.f32 %v1203_v60 }
 0x635   :  { %v1838_v62 = vpop.eup %1837 }
 0x636   :  { %v1206_v63 = vmul.f32 %v1838_v62, %v1174_v61 }
 0x638   :  { %1395 = vperm.xlu0 %1792, %v1206_v63  }
 0x639   :  { %v1840_v1 = vpop.eup %1839 }
 0x63a   :  { %v1207_v3 = vmul.f32 %v1840_v1, %v1175_v0 }
 0x63c   :  { %1400 = vperm.xlu1 %1793, %v1207_v3   ;;  %1414 = vperm.xlu0 %1792, %v1177_v2  }
 0x640   :  { %1409 = vperm.xlu1 %1793, %v1176_v4   ;;  %v1185_v4 = vld [vmem:[%s2360_s22 + $0x8] sm:$0xff] }
 0x6b7   :  { %v1396_v7 = vpop.permute.xlu0 %1395 }
 0x6bb   :  { %v1401_v5 = vpop.permute.xlu1 %1400  ;;  %v1415_v19 = vpop.permute.xlu0 %1414 }
 0x6bf   :  { %v1410_v12 = vpop.permute.xlu1 %1409 }
 0x6c7   :  { %v1382_v8 = vpop.f32.mrb[8].mxu0 }
 0x6c8   :  { %v1403_v9 = vmul.f32 %v1396_v7, %v1382_v8  ;;  %v1384_v10 = vpop.f32.mrb[9].mxu0 }
 0x6c9   :  { %v1404_v11 = vmul.f32 %v1396_v7, %v1384_v10  ;;  %v1184_v7 = vld [vmem:[%s2360_s22] sm:$0xff] }
 0x6ca   :  { %v1417_v14 = vadd.f32 %v1410_v12, %v1403_v9 }
 0x6cb   :  { %v1388_v13 = vpop.f32.mrb[10].mxu0  ;;  %v1418_v20 = vadd.f32 %v1410_v12, %v1404_v11 }
 0x6cc   :  { %v1405_v15 = vmul.f32 %v1401_v5, %v1388_v13  ;;  %v1390_v17 = vpop.f32.mrb[11].mxu0  ;;  %v1421_v28 = vmax.f32 %v1417_v14, 0.0 }
 0x6cd   :  { %v1406_v21 = vmul.f32 %v1401_v5, %v1390_v17  ;;  %v1422_v30 = vmax.f32 %v1418_v20, 0.0 }
 0x6ce   :  { %v1419_v26 = vadd.f32 %v1415_v19, %v1405_v15 }
 0x6cf   :  { %v1420_v27 = vadd.f32 %v1415_v19, %v1406_v21 }
 0x6d0   :  { %v1423_v29 = vmax.f32 %v1419_v26, 0.0 }
 0x6d1   :  { %v1424_v31 = vmax.f32 %v1420_v27, 0.0 }
 0x6d2   :  { %v1756_v32 = vpack.c.bf16 %v1423_v29, %v1421_v28  ;;  %v1814_v33 = vpack.i.bf16 %v1423_v29, %v1421_v28 }
 0x6d3   :  { %v1819_v34 = vpack.i.bf16 %v1424_v31, %v1422_v30  ;;  %v1754_v35 = vpack.c.bf16 %v1424_v31, %v1422_v30 }
 0x6d4   :  { %1815 = vrot.lane.b32.xlu1 %v1814_v33, %s1873_s14 }
 0x6d5   :  { %1820 = vrot.lane.b32.xlu0 %v1819_v34, %s1873_s14  ;;  %1755 = vmatprep.subr.bf16.mxu1 %v1754_v35 }
 0x6d6   :  { %1757 = vmatpush1.bf16.msra.mxu1 %v1756_v32 }
 0x6d9   :  { %1726 = vmatmul.mubr.msk.f32.vlgmr.msra.gmra.mrb[10].mxu1 %vm836_vm9, %v1180_v36 }
 0x6da   :  { %1539 = vmatprep.mubr.f32.mxu1 %v1870_v6 }
 0x6dd   :  { %1727 = vmatmul.mubr.msk.f32.gmra.mrb[12].mxu1 %vm836_vm9, %v1181_v37 }
 0x6de   :  { %1616 = vmatprep.mubr.f32.mxu1 %v1870_v6 }
 0x6f4   :  { %1433 = vadd.xlane.f32.xlu0 %v1432_v41 }
 0x6f8   :  { %1430 = vadd.xlane.f32.xlu1 %v1429_v44  ;;  %1436 = vadd.xlane.f32.xlu0 %v1435_v45 }
 0x6fc   :  { %1439 = vadd.xlane.f32.xlu1 %v1438_v47 }
 0x746   :  { %v1816_v48 = vpop.permute.xlu1 %1815 }
 0x747   :  { %v1818_v49 = vunpack.i.h.bf16 %v1816_v48  ;;  %v1817_v50 = vunpack.i.l.bf16 %v1816_v48  ;;  %v1821_v51 = vpop.permute.xlu0 %1820 }
 0x748   :  { %v1823_v18 = vunpack.i.h.bf16 %v1821_v51  ;;  %v1822_v53 = vunpack.i.l.bf16 %v1821_v51 }
 0x74a   :  { %v1456_v55 = vsel %vm1216_vm12, %v1818_v49, %v1823_v18  ;;  %v1458_v56 = vsel %vm1216_vm12, %v1823_v18, %v1818_v49  ;;  %v1455_v57 = vsel %vm1216_vm12, %v1817_v50, %v1822_v53  ;;  %v1457_v58 = vsel %vm1216_vm12, %v1822_v53, %v1817_v50 }
 0x74b   :  { %v1758_v59 = vpack.c.bf16 %v1456_v55, %v1455_v57  ;;  %v1761_v60 = vpack.c.bf16 %v1458_v56, %v1457_v58 }
 0x74d   :  { %1760 = vmatprep.subr.msk.bf16.mxu1 %vm2246_vm15, %v1758_v59 }
 0x74e   :  { %1763 = vmatpush1.bf16.msk.msra.mxu1 %vm2250_vm0, %v1761_v60 }
 0x751   :  { %1732 = vmatmul.mubr.msk.f32.vlgmr.msra.gmra.mrb[10].mxu1 %vm836_vm9, %v1178_v40 }
 0x752   :  { %1622 = vmatprep.mubr.f32.mxu1 %v1870_v6  ;;  %v1183_v6 = vld [vmem:[%s2359_s21 + $0x8] sm:$0xff]  ;;  %s1874_s21 = smov [#allocation2]  }
 0x753   :  { %s1678_s22 = sshll.u32 %s1874_s21, 4  ;;  %s1679_s22 = int_to_ptr.vmem [resolvable:$true] %s1678_s22 }
 0x754   :  { %s1845_s15 = scalar_lea.vmem %s1679_s22, 512  ;;  %p1850_p1 = scmp.lt.s32.totalorder %s1679_s22, %s1679_s22 }
 0x755   :  { %1733 = vmatmul.mubr.msk.f32.gmra.mrb[12].mxu1 %vm836_vm9, %v1179_v38  ;;  %p1846_p0 = scmp.ne.s32.totalorder %s1679_s22, %s1845_s15  ;;  %p1851_p2 = scmp.lt.s32.totalorder %s1845_s15, %s1845_s15 }
 0x757   :  { %p1852_p3 = por %p1851_p2, %p1850_p1 }
 0x759   :  { %p1853_p4 = pnand %p1852_p3, %p1846_p0 }
 0x781   :  { %v1434_v61 = vpop.xlane.xlu0 %1433 }
 0x785   :  { %v1431_v62 = vpop.xlane.xlu1 %1430  ;;  %v1437_v63 = vpop.xlane.xlu0 %1436 }
 0x786   :  { %v1441_v0 = vadd.f32 %v1437_v63, %v1431_v62 }
 0x788   :  { %1841 = vrsqrt.f32 %v1441_v0 }
 0x789   :  { %v1440_v16 = vpop.xlane.xlu1 %1439 }
 0x78a   :  { %v1442_v1 = vadd.f32 %v1440_v16, %v1434_v61 }
 0x78c   :  { %1843 = vrsqrt.f32 %v1442_v1 }
 0x792   :  { %v1842_v54 = vpop.eup %1841 }
 0x793   :  { %v1445_v2 = vmul.f32 %v1842_v54, %v1182_v52 }
 0x795   :  { %1631 = vperm.xlu0 %1792, %v1445_v2  }
 0x796   :  { %v1844_v3 = vpop.eup %1843 }
 0x797   :  { %v1446_v5 = vmul.f32 %v1844_v3, %v1183_v6 }
 0x799   :  { %1636 = vperm.xlu1 %1793, %v1446_v5   ;;  %1650 = vperm.xlu0 %1792, %v1185_v4  }
 0x79d   :  { %1645 = vperm.xlu1 %1793, %v1184_v7  }
 0x814   :  { %v1632_v9 = vpop.permute.xlu0 %1631 }
 0x818   :  { %v1637_v8 = vpop.permute.xlu1 %1636  ;;  %v1651_v27 = vpop.permute.xlu0 %1650 }
 0x81c   :  { %v1646_v13 = vpop.permute.xlu1 %1645 }
 0x824   :  { %v1618_v10 = vpop.f32.mrb[10].mxu1 }
 0x825   :  { %v1639_v11 = vmul.f32 %v1632_v9, %v1618_v10  ;;  %v1620_v12 = vpop.f32.mrb[11].mxu1 }
 0x826   :  { %v1640_v14 = vmul.f32 %v1632_v9, %v1620_v12 }
 0x827   :  { %v1653_v15 = vadd.f32 %v1646_v13, %v1639_v11 }
 0x828   :  { %v1654_v17 = vadd.f32 %v1646_v13, %v1640_v14  ;;  %v1624_v19 = vpop.f32.mrb[12].mxu1 }
 0x829   :  { %v1657_v20 = vmax.f32 %v1653_v15, 0.0  ;;  %v1641_v21 = vmul.f32 %v1637_v8, %v1624_v19  ;;  %v1626_v26 = vpop.f32.mrb[13].mxu1 }
 0x82a   :  { %v1658_v28 = vmax.f32 %v1654_v17, 0.0  ;;  %v1642_v29 = vmul.f32 %v1637_v8, %v1626_v26 }
 0x82b   :  { %v1661_v30 = vadd.f32 %v1657_v20, %v2197_v22  ;;  %v1655_v31 = vadd.f32 %v1651_v27, %v1641_v21 }
 0x82c   :  { %v1662_v32 = vadd.f32 %v1658_v28, %v2201_v24  ;;  %v1656_v33 = vadd.f32 %v1651_v27, %v1642_v29 }
 0x82d   :  { %v1665_v34 = vmax.f32 %v1661_v30, 0.0  ;;  %v1659_v35 = vmax.f32 %v1655_v31, 0.0 }
 0x82e   :  { %v1666_v36 = vmax.f32 %v1662_v32, 0.0  ;;  %v1660_v37 = vmax.f32 %v1656_v33, 0.0 }
 0x82f   :  { %1669 = vst [vmem:[#allocation2] sm:$0xff] %v1665_v34  ;;  %v1663_v38 = vadd.f32 %v1659_v35, %v2199_v23 }
 0x830   :  { %1670 = vst [vmem:[#allocation2 + $0x8] sm:$0xff] %v1666_v36  ;;  %v1664_v39 = vadd.f32 %v1660_v37, %v2203_v25 }
 0x831   :  { %v1667_v40 = vmax.f32 %v1663_v38, 0.0 }
 0x832   :  { %v1668_v41 = vmax.f32 %v1664_v39, 0.0 }
 0x833   :  { %1671 = vst [vmem:[#allocation2 + $0x10] sm:$0xff] %v1667_v40 }
 0x834   :  { %1672 = vst [vmem:[#allocation2 + $0x18] sm:$0xff] %v1668_v41 }
 0x835   :  { %1856 = shalt.err (!%p1853_p4)
}
 0x836   :  { %s1857_s17 = scalar_lea.hbm %s2361_s23, 512 }
 0x837   :  { %p1858_p5 = scmp.ne.s32.totalorder %s2361_s23, %s1857_s17  ;;  %p1861_p6 = scmp.lt.u32.totalorder %s1857_s17, %s2361_s23 }
 0x839   :  { %p1863_p7 = pnand %p1861_p6, %p1858_p5 }
 0x83b   :  { %1866 = shalt.err (!%p1863_p7)
}
 0x83c   :  { %s1875_s12 = smov 256   ;;  %s1876_s1 = smov 16  }
 0x83d   :  { %1684 = dma.vmem_to_hbm [thread:$0]  %s1679_s22, 512, %s2361_s23, [#allocation3], %s1875_s12, %s1875_s12, %s1876_s1  }
 0x83e   :  { %1867 = dma.done.wait [#allocation3], 512  }
 0x83f   :  { %1868 = vsyncadd [#allocation3], 4294966784 }
 0x840   :  { %1688 = vsyncpa [#allocation3], 1 }

</bundles_post_ra>
